<compile_context>
chip_gen: v7x
topology: tpu7x:2x2x1
jax: 0.10.0
libtpu: 0.0.40
codegen_flags: <defaults>
</compile_context>

<pallas_src>
import functools

import jax
import jax.numpy as jnp
from jax.experimental import pallas as pl
from jax.experimental.pallas import tpu as pltpu


_LANE = 128
_SUBLANE = 8
_ACC_BYTES = 128 * 1024        # f32 conv accumulator budget: kept in vregs (no RMW spill)

_VMEM_CACHE = None


def _round_up(x, m):
    return (x + m - 1) // m * m


def _vmem_params():
    """(vmem_limit_bytes, tile_budget_bytes, tm_cap) per TPU generation."""
    global _VMEM_CACHE
    if _VMEM_CACHE is None:
        cap = 64 * 1024 * 1024
        try:
            cap = int(pltpu.get_tpu_info().vmem_capacity_bytes)
        except Exception:
            pass
        if cap >= 100 * 1024 * 1024:            # v5e / v6e: 128 MiB per TensorCore
            _VMEM_CACHE = (80 * 1024 * 1024, 56 * 1024 * 1024, 1024)
        else:                                   # v7x: 64 MiB per TensorCore
            _VMEM_CACHE = (32 * 1024 * 1024, 24 * 1024 * 1024, 512)
    return _VMEM_CACHE


# ---------------------------------------------------------------------------
# Pallas kernels
# ---------------------------------------------------------------------------
def _matmul_bias_relu_kernel(a_ref, b_ref, bias_ref, o_ref):
    # 1x1 conv as matmul; BN scale folded into b, folded bias + ReLU here.
    y = jnp.dot(a_ref[...], b_ref[...], preferred_element_type=jnp.float32)
    o_ref[...] = jnp.maximum(y + bias_ref[...], 0.0).astype(o_ref.dtype)


def _matmul_bias_res_relu_kernel(a_ref, b_ref, bias_ref, r_ref, o_ref):
    # Last 1x1 conv, identity shortcut: matmul + bias + residual add + ReLU.
    y = jnp.dot(a_ref[...], b_ref[...], preferred_element_type=jnp.float32)
    y = y + bias_ref[...] + r_ref[...].astype(jnp.float32)
    o_ref[...] = jnp.maximum(y, 0.0).astype(o_ref.dtype)


def _matmul2_bias_relu_kernel(a_ref, b_ref, a2_ref, b2_ref, bias_ref, o_ref):
    # Last 1x1 conv with the projection shortcut fused in: two dots into one f32
    # accumulator, combined folded-BN bias, ReLU.  The shortcut never touches HBM.
    y = jnp.dot(a_ref[...], b_ref[...], preferred_element_type=jnp.float32)
    y = y + jnp.dot(a2_ref[...], b2_ref[...], preferred_element_type=jnp.float32)
    o_ref[...] = jnp.maximum(y + bias_ref[...], 0.0).astype(o_ref.dtype)


def _conv3x3_bias_relu_kernel(x_ref, w_ref, bias_ref, o_ref, *, stride, th, wo):
    # x_ref:    (stride*stride, Hq, Wq, C)  phase-decomposed, zero-padded image
    #           (block index depends only on the batch axis -> resident across row tiles)
    # w_ref:    (9, C, Cout)                per-tap weights (BN scale folded in)
    # bias_ref: (1, Cout) f32
    # o_ref:    (1, th, wo, Cout)           one tile of th output rows
    #
    # Each tap is a full-width, aligned band matmul; the dj column shift is applied to
    # the f32 tap result with pltpu.roll (XLU) so no unaligned sublane slices / relayout
    # copies are generated.  The accumulator is small enough to live in vregs.
    # TODO(synk): concatenate the per-row taps along K (K = 3*C) for deeper MXU
    # contractions on v6e/v7x; K = C is already a full pass on v5e.
    j = pl.program_id(1)
    row0 = j * th
    wq = x_ref.shape[2]
    c_in = x_ref.shape[3]
    c_out = o_ref.shape[3]
    rows = th * wq

    acc = jnp.zeros((rows, c_out), jnp.float32)
    for di in range(3):
        oh = di // stride
        bands = {}
        for dj in range(3):
            pc = dj % stride
            if pc not in bands:
                p = (di % stride) * stride + pc
                band = x_ref[p, pl.ds(row0 + oh, th), :, :]
                bands[pc] = band.reshape(rows, c_in)
            z = jnp.dot(bands[pc], w_ref[di * 3 + dj],
                        preferred_element_type=jnp.float32)
            ow = dj // stride
            if ow:
                # shift tap result left by `ow` columns (wrapped rows land in the
                # discarded cols >= wo); pltpu.roll uses the XLU slot.
                z = pltpu.roll(z, shift=rows - ow, axis=0)
            acc = acc + z

    y = jnp.maximum(acc + bias_ref[...], 0.0)
    o_ref[0] = y.reshape(th, wq, c_out)[:, :wo, :].astype(o_ref.dtype)


# ---------------------------------------------------------------------------
# Tile planning (VMEM-budgeted, robust to any M)
# ---------------------------------------------------------------------------
def _plan_m(m, k, k2, n, has_residual, budget, tm_cap, out_bytes):
    m8 = _round_up(max(m, 1), _SUBLANE)
    fixed = 2 * (k + k2) * n * 2 + 2 * n * 4          # double-buffered bf16 weights + bias
    per_row = (2 * (k + k2) * 2                       # A (+A2), double-buffered bf16
               + 2 * n * out_bytes                    # out, double-buffered
               + 4 * n)                               # f32 epilogue value
    if has_residual:
        per_row += 2 * n * 2                          # residual, double-buffered bf16
    avail = max(budget - fixed, per_row * _SUBLANE)
    tm = avail // per_row
    tm = min(tm, tm_cap, m8)
    if m8 >= 4 * _SUBLANE:
        # >= 4 grid steps: two pipelined steps per TensorCore on v7x's 2-TC megacore.
        tm = min(tm, _round_up(pl.cdiv(m8, 4), _SUBLANE))
    tm = max(_SUBLANE, (tm // _SUBLANE) * _SUBLANE)
    grid_m = pl.cdiv(m8, tm)
    vmem_need = fixed + per_row * tm + (2 << 20)
    return tm, grid_m, grid_m * tm, vmem_need


# ---------------------------------------------------------------------------
# pallas_call wrappers
# ---------------------------------------------------------------------------
def fused_matmul(a, b, bias, *, a2=None, b2=None, residual=None,
                 out_dtype=jnp.bfloat16):
    """relu(a @ b + bias [+ a2 @ b2] [+ residual]), f32 accumulation, bf16 output."""
    assert a2 is None or residual is None
    m, k = a.shape
    n_out = b.shape[1]
    k2 = 0 if a2 is None else a2.shape[1]
    limit, budget, tm_cap = _vmem_params()
    tm, grid_m, m_pad, vmem_need = _plan_m(
        m, k, k2, n_out, residual is not None, budget, tm_cap,
        jnp.dtype(out_dtype).itemsize)
    # TODO(synk): add an N/K grid axis for shapes where the (K+K2) x N weights alone
    # exceed the per-step VMEM budget (not reached by ResNet-50 shapes).
    limit = max(limit, min(vmem_need, 100 * 1024 * 1024))

    if m_pad != m:
        pad_rows = m_pad - m
        a = jnp.pad(a, ((0, pad_rows), (0, 0)))
        if a2 is not None:
            a2 = jnp.pad(a2, ((0, pad_rows), (0, 0)))
        if residual is not None:
            residual = jnp.pad(residual, ((0, pad_rows), (0, 0)))

    in_specs = [pl.BlockSpec((tm, k), lambda i: (i, 0)),
                pl.BlockSpec((k, n_out), lambda i: (0, 0))]
    args = [a, b]
    if a2 is not None:
        in_specs += [pl.BlockSpec((tm, k2), lambda i: (i, 0)),
                     pl.BlockSpec((k2, n_out), lambda i: (0, 0))]
        args += [a2, b2]
    in_specs.append(pl.BlockSpec((1, n_out), lambda i: (0, 0)))
    args.append(bias)
    if residual is not None:
        in_specs.append(pl.BlockSpec((tm, n_out), lambda i: (i, 0)))
        args.append(residual)
        kernel = _matmul_bias_res_relu_kernel
    elif a2 is not None:
        kernel = _matmul2_bias_relu_kernel
    else:
        kernel = _matmul_bias_relu_kernel

    out = pl.pallas_call(
        kernel,
        out_shape=jax.ShapeDtypeStruct((m_pad, n_out), out_dtype),
        grid_spec=pltpu.PrefetchScalarGridSpec(
            num_scalar_prefetch=0,
            grid=(grid_m,),
            in_specs=in_specs,
            out_specs=pl.BlockSpec((tm, n_out), lambda i: (i, 0)),
        ),
        compiler_params=pltpu.CompilerParams(
            dimension_semantics=("parallel",),
            vmem_limit_bytes=limit),
    )(*args)
    return out[:m] if m_pad != m else out


def conv3x3_bias_relu(x_nhwc, w_taps, bias, *, stride):
    """Fused 3x3 conv (pad=1, stride) + folded-BN bias + ReLU, no HBM im2col.

    The padded input is split into stride x stride spatial phases so every tap is a
    full-width, aligned VMEM band; output rows are tiled so the f32 accumulator stays
    in registers; column shifts are done with pltpu.roll on the tap result.
    """
    n, h, w, c = x_nhwc.shape
    c_out = w_taps.shape[-1]
    pad = 1
    ho = (h + 2 * pad - 3) // stride + 1
    wo = (w + 2 * pad - 3) // stride + 1
    ow_max = 2 // stride
    wq = _round_up(max(-(-(w + 2 * pad) // stride), wo + ow_max), _SUBLANE)

    # rows of output per grid step: keep the (th*wq, c_out) f32 accumulator in vregs,
    # and give each image >= 4 row tiles (v7x: >= 2 pipelined steps per TensorCore).
    th = max(1, _ACC_BYTES // (wq * c_out * 4))
    if ho >= 4:
        th = min(th, -(-ho // 4))
    th = min(th, ho)
    grid_h = pl.cdiv(ho, th)
    ho_pad = grid_h * th
    hq = ho_pad + 2

    # TODO(synk): handle the pad=1 halo inside the kernel (masked boundary taps) so the
    # wrapper-side jnp.pad pass over the activation is not needed for stride==1 blocks.
    xp = jnp.pad(x_nhwc, ((0, 0),
                          (pad, hq * stride - h - pad),
                          (pad, wq * stride - w - pad),
                          (0, 0)))
    if stride == 1:
        phases = xp                                   # single phase: no reshuffle pass
    else:
        xp = xp.reshape(n, hq, stride, wq, stride, c)
        phases = jnp.transpose(xp, (0, 2, 4, 1, 3, 5))
        phases = phases.reshape(n * stride * stride, hq, wq, c)
    ss = stride * stride

    limit, _, _ = _vmem_params()
    kernel = functools.partial(_conv3x3_bias_relu_kernel,
                               stride=stride, th=th, wo=wo)
    out = pl.pallas_call(
        kernel,
        out_shape=jax.ShapeDtypeStruct((n, ho_pad, wo, c_out), jnp.bfloat16),
        grid_spec=pltpu.PrefetchScalarGridSpec(
            num_scalar_prefetch=0,
            grid=(n, grid_h),
            in_specs=[
                pl.BlockSpec((ss, hq, wq, c), lambda b, j: (b, 0, 0, 0)),
                pl.BlockSpec((9, c, c_out), lambda b, j: (0, 0, 0)),
                pl.BlockSpec((1, c_out), lambda b, j: (0, 0)),
            ],
            out_specs=pl.BlockSpec((1, th, wo, c_out), lambda b, j: (b, j, 0, 0)),
        ),
        compiler_params=pltpu.CompilerParams(
            dimension_semantics=("parallel", "parallel"),
            vmem_limit_bytes=limit),
    )(phases, w_taps, bias)
    return out if ho_pad == ho else out[:, :ho]


# ---------------------------------------------------------------------------
# Parameter prep: BN folding into weights, channel padding, bf16 cast
# ---------------------------------------------------------------------------
def _fold_bn(gamma, beta, mean, var, eps=1e-5):
    scale = gamma / jnp.sqrt(var + eps)
    bias = beta - mean * scale
    return scale.astype(jnp.float32), bias.astype(jnp.float32)


def _prep_1x1(w_oihw, bn, k_pad, n_pad):
    c_out, c_in = w_oihw.shape[0], w_oihw.shape[1]
    scale, bias = _fold_bn(*bn)
    wmat = w_oihw.reshape(c_out, c_in).T * scale[None, :]     # fold BN scale into weights
    wmat = jnp.pad(wmat, ((0, k_pad - c_in), (0, n_pad - c_out))).astype(jnp.bfloat16)
    bias = jnp.pad(bias, (0, n_pad - c_out)).reshape(1, n_pad)
    return wmat, bias


def _prep_3x3(w_oihw, bn, k_pad, n_pad):
    c_out, c_in = w_oihw.shape[0], w_oihw.shape[1]
    scale, bias = _fold_bn(*bn)
    wtap = jnp.transpose(w_oihw, (2, 3, 1, 0)).reshape(9, c_in, c_out)
    wtap = wtap * scale[None, None, :]
    wtap = jnp.pad(wtap, ((0, 0), (0, k_pad - c_in), (0, n_pad - c_out))).astype(jnp.bfloat16)
    bias = jnp.pad(bias, (0, n_pad - c_out)).reshape(1, n_pad)
    return wtap, bias


# ---------------------------------------------------------------------------
# BottleNeck forward (NCHW in / NCHW out, like the PyTorch module)
# ---------------------------------------------------------------------------
def bottleneck_forward(x_nchw, params, stride):
    n, c_in, h, w = x_nchw.shape
    c_mid = params["w1"].shape[0]
    c_out = params["w3"].shape[0]
    cin_p, cmid_p, cout_p = (_round_up(c, _LANE) for c in (c_in, c_mid, c_out))

    # NCHW -> NHWC once per block; channels padded to lane-dense 128 multiples, bf16.
    x = jnp.transpose(x_nchw, (0, 2, 3, 1))
    x = jnp.pad(x, ((0, 0), (0, 0), (0, 0), (0, cin_p - c_in))).astype(jnp.bfloat16)

    w1, b1 = _prep_1x1(params["w1"], params["bn1"], cin_p, cmid_p)
    w2, b2 = _prep_3x3(params["w2"], params["bn2"], cmid_p, cmid_p)
    w3, b3 = _prep_1x1(params["w3"], params["bn3"], cmid_p, cout_p)

    # conv1 (1x1) + bn1 + relu
    y1 = fused_matmul(x.reshape(n * h * w, cin_p), w1, b1)
    y1 = y1.reshape(n, h, w, cmid_p)

    # conv2 (3x3, stride, pad=1) + bn2 + relu, taps fused in-kernel (no im2col in HBM)
    y2 = conv3x3_bias_relu(y1, w2, b2, stride=stride)
    _, ho, wo, _ = y2.shape
    y2f = y2.reshape(n * ho * wo, cmid_p)

    if stride != 1 or c_in != c_out:
        # projection shortcut fused into the final kernel: two dots, one epilogue,
        # no intermediate "short" tensor in HBM.
        ws, bs = _prep_1x1(params["ws"], params["bns"], cin_p, cout_p)
        # TODO(synk): fold the spatial subsample into the kernel's input indexing instead
        # of materializing it with an XLA strided slice.
        xs = x[:, ::stride, ::stride, :][:, :ho, :wo, :].reshape(n * ho * wo, cin_p)
        y3 = fused_matmul(y2f, w3, b3 + bs, a2=xs, b2=ws)
    else:
        short = x.reshape(n * ho * wo, cin_p)     # cin_p == cout_p on the identity path
        y3 = fused_matmul(y2f, w3, b3, residual=short)

    y3 = y3.reshape(n, ho, wo, cout_p)[..., :c_out]
    return jnp.transpose(y3, (0, 3, 1, 2)).astype(jnp.float32)   # back to NCHW


# ---------------------------------------------------------------------------
# Pure-JAX f32 reference (mirrors the PyTorch forward, inference-mode BN)
# ---------------------------------------------------------------------------
def bottleneck_reference(x, params, stride, eps=1e-5):
    def conv(x, w, s, p):
        return jax.lax.conv_general_dilated(
            x, w, (s, s), [(p, p), (p, p)],
            dimension_numbers=("NCHW", "OIHW", "NCHW"))

    def bn(x, gamma, beta, mean, var):
        sh = (1, -1, 1, 1)
        return ((x - mean.reshape(sh)) / jnp.sqrt(var.reshape(sh) + eps)
                * gamma.reshape(sh) + beta.reshape(sh))

    r = jax.nn.relu(bn(conv(x, params["w1"], 1, 0), *params["bn1"]))
    r = jax.nn.relu(bn(conv(r, params["w2"], stride, 1), *params["bn2"]))
    r = bn(conv(r, params["w3"], 1, 0), *params["bn3"])
    cin, cout = x.shape[1], params["w3"].shape[0]
    if stride != 1 or cin != cout:
        s = bn(conv(x, params["ws"], stride, 0), *params["bns"])
    else:
        s = x
    return jax.nn.relu(r + s)


# ---------------------------------------------------------------------------
if __name__ == "__main__":
    key = jax.random.PRNGKey(0)

    def bn_params(k, c):
        k1, k2, k3, k4 = jax.random.split(k, 4)
        gamma = jax.random.uniform(k1, (c,), minval=0.5, maxval=1.5)
        beta = 0.1 * jax.random.normal(k2, (c,))
        mean = 0.1 * jax.random.normal(k3, (c,))
        var = jax.random.uniform(k4, (c,), minval=0.5, maxval=1.5)
        return (gamma, beta, mean, var)

    def make_params(k, cin, cmid, cout):
        ks = jax.random.split(k, 8)
        p = {
            "w1": 0.2 * jax.random.normal(ks[0], (cmid, cin, 1, 1)),
            "bn1": bn_params(ks[1], cmid),
            "w2": 0.2 * jax.random.normal(ks[2], (cmid, cmid, 3, 3)),
            "bn2": bn_params(ks[3], cmid),
            "w3": 0.2 * jax.random.normal(ks[4], (cout, cmid, 1, 1)),
            "bn3": bn_params(ks[5], cout),
            "ws": 0.2 * jax.random.normal(ks[6], (cout, cin, 1, 1)),
            "bns": bn_params(ks[7], cout),
        }
        return jax.tree.map(lambda t: t.astype(jnp.float32), p)

    fwd = jax.jit(bottleneck_forward, static_argnames="stride")

    configs = [
        # (N, Cin, H, W, Cmid, stride): projection shortcut (stride 2) ...
        (2, 16, 16, 16, 8, 2),
        # ... and identity shortcut (stride 1, Cin == Cmid * expansion)
        (2, 32, 8, 8, 8, 1),
    ]
    for (N, Cin, H, W, Cmid, stride) in configs:
        Cout = Cmid * 4  # expansion = 4
        key, pkey, xkey = jax.random.split(key, 3)
        params = make_params(pkey, Cin, Cmid, Cout)
        x = jax.random.normal(xkey, (N, Cin, H, W), dtype=jnp.float32)

        out = jax.block_until_ready(fwd(x, params, stride=stride))
        ref = bottleneck_reference(x, params, stride)

        ho = (H - 1) // stride + 1
        wo = (W - 1) // stride + 1
        assert out.shape == ref.shape == (N, Cout, ho, wo), out.shape
        max_err = float(jnp.max(jnp.abs(out - ref)))
        # bf16 MXU path vs f32 reference -> tolerance for a 3-matmul bf16 chain.
        assert jnp.allclose(out, ref, rtol=5e-2, atol=1.5e-1), \
            f"stride={stride}: max abs err {max_err}"
    print("KERNEL_OK")
</pallas_src>

<mosaic_0001>
module attributes {stable_mosaic.version = 11 : i64} {
  func.func @_matmul_bias_relu_kernel(%arg0: i32, %arg1: memref<128x128xbf16, #tpu.memory_space<vmem>>, %arg2: memref<128x128xbf16, #tpu.memory_space<vmem>>, %arg3: memref<1x128xf32, #tpu.memory_space<vmem>>, %arg4: memref<128x128xbf16, #tpu.memory_space<vmem>>) attributes {dimension_semantics = [#tpu.dimension_semantics<parallel>], iteration_bounds = array<i64: 4>, scalar_prefetch = 0 : i64, scratch_operands = 0 : i64, tpu.core_type = #tpu.core_type<tc>, window_params = [{transform_indices = @transform_0, window_bounds = array<i64: 128, 128>}, {pipeline_mode = #tpu.pipeline_mode<synchronous>, transform_indices = @transform_1, window_bounds = array<i64: 128, 128>}, {pipeline_mode = #tpu.pipeline_mode<synchronous>, transform_indices = @transform_2, window_bounds = array<i64: 1, 128>}, {transform_indices = @transform_3, window_bounds = array<i64: 128, 128>}]} {
    %c0 = arith.constant 0 : index
    %c0_0 = arith.constant 0 : index
    %0 = vector.load %arg1[%c0, %c0_0] : memref<128x128xbf16, #tpu.memory_space<vmem>>, vector<128x128xbf16>
    %c0_1 = arith.constant 0 : index
    %c0_2 = arith.constant 0 : index
    %1 = vector.load %arg2[%c0_1, %c0_2] : memref<128x128xbf16, #tpu.memory_space<vmem>>, vector<128x128xbf16>
    %cst = arith.constant dense<0.000000e+00> : vector<128x128xf32>
    %2 = tpu.matmul %0, %1, %cst {dimension_numbers = #tpu.dot_dimension_numbers<[1], [0], [0], [1], [0, 0, 1, 1], [], []>} : vector<128x128xbf16>, vector<128x128xbf16>, vector<128x128xf32> -> vector<128x128xf32>
    %c0_3 = arith.constant 0 : index
    %c0_4 = arith.constant 0 : index
    %3 = vector.load %arg3[%c0_3, %c0_4] : memref<1x128xf32, #tpu.memory_space<vmem>>, vector<1x128xf32>
    %4 = vector.broadcast %3 : vector<1x128xf32> to vector<128x128xf32>
    %5 = arith.addf %2, %4 : vector<128x128xf32>
    %cst_5 = arith.constant 0.000000e+00 : f32
    %6 = vector.broadcast %cst_5 : f32 to vector<128x128xf32>
    %7 = arith.maximumf %5, %6 : vector<128x128xf32>
    %8 = arith.truncf %7 : vector<128x128xf32> to vector<128x128xbf16>
    %c0_6 = arith.constant 0 : index
    %c0_7 = arith.constant 0 : index
    %9 = vector.load %arg4[%c0_6, %c0_7] : memref<128x128xbf16, #tpu.memory_space<vmem>>, vector<128x128xbf16>
    tpu.vector_store %arg4[%c0_6, %c0_7], %8 {strides = array<i32>} : memref<128x128xbf16, #tpu.memory_space<vmem>>, vector<128x128xbf16>,
    return
  }
  func.func @transform_0(%arg0: i32) -> (i32, i32) {
    %c0_i32 = arith.constant 0 : i32
    %c0_i32_0 = arith.constant 0 : i32
    return %arg0, %c0_i32 : i32, i32
  }
  func.func @transform_1(%arg0: i32) -> (i32, i32) {
    %c0_i32 = arith.constant 0 : i32
    %c0_i32_0 = arith.constant 0 : i32
    %c0_i32_1 = arith.constant 0 : i32
    return %c0_i32, %c0_i32_0 : i32, i32
  }
  func.func @transform_2(%arg0: i32) -> (i32, i32) {
    %c0_i32 = arith.constant 0 : i32
    %c0_i32_0 = arith.constant 0 : i32
    %c0_i32_1 = arith.constant 0 : i32
    return %c0_i32, %c0_i32_0 : i32, i32
  }
  func.func @transform_3(%arg0: i32) -> (i32, i32) {
    %c0_i32 = arith.constant 0 : i32
    %c0_i32_0 = arith.constant 0 : i32
    return %arg0, %c0_i32 : i32, i32
  }
}

module attributes {stable_mosaic.version = 11 : i64} {
  func.func @_conv3x3_bias_relu_kernel(%arg0: i32, %arg1: i32, %arg2: memref<4x10x16x128xbf16, #tpu.memory_space<vmem>>, %arg3: memref<9x128x128xbf16, #tpu.memory_space<vmem>>, %arg4: memref<1x128xf32, #tpu.memory_space<vmem>>, %arg5: memref<1x2x8x128xbf16, #tpu.memory_space<vmem>>) attributes {dimension_semantics = [#tpu.dimension_semantics<parallel>, #tpu.dimension_semantics<parallel>], iteration_bounds = array<i64: 2, 4>, scalar_prefetch = 0 : i64, scratch_operands = 0 : i64, tpu.core_type = #tpu.core_type<tc>, window_params = [{transform_indices = @transform_0, window_bounds = array<i64: 4, 10, 16, 128>}, {pipeline_mode = #tpu.pipeline_mode<synchronous>, transform_indices = @transform_1, window_bounds = array<i64: 9, 128, 128>}, {pipeline_mode = #tpu.pipeline_mode<synchronous>, transform_indices = @transform_2, window_bounds = array<i64: 1, 128>}, {transform_indices = @transform_3, window_bounds = array<i64: 1, 2, 8, 128>}]} {
    %c2_i32 = arith.constant 2 : i32
    %0 = arith.muli %arg1, %c2_i32 : i32
    %cst = arith.constant 0.000000e+00 : f32
    %1 = vector.broadcast %cst : f32 to vector<32x128xf32>
    %c0_i32 = arith.constant 0 : i32
    %2 = arith.addi %0, %c0_i32 : i32
    %c0 = arith.constant 0 : index
    %3 = arith.index_cast %2 : i32 to index
    %c0_0 = arith.constant 0 : index
    %c0_1 = arith.constant 0 : index
    %4 = vector.load %arg2[%c0, %3, %c0_0, %c0_1] : memref<4x10x16x128xbf16, #tpu.memory_space<vmem>>, vector<1x2x16x128xbf16>
    %5 = vector.shape_cast %4 : vector<1x2x16x128xbf16> to vector<2x16x128xbf16>
    %6 = vector.shape_cast %5 : vector<2x16x128xbf16> to vector<32x128xbf16>
    %c0_2 = arith.constant 0 : index
    %c0_3 = arith.constant 0 : index
    %c0_4 = arith.constant 0 : index
    %7 = vector.load %arg3[%c0_2, %c0_3, %c0_4] : memref<9x128x128xbf16, #tpu.memory_space<vmem>>, vector<1x128x128xbf16>
    %8 = vector.shape_cast %7 : vector<1x128x128xbf16> to vector<128x128xbf16>
    %cst_5 = arith.constant dense<0.000000e+00> : vector<32x128xf32>
    %9 = tpu.matmul %6, %8, %cst_5 {dimension_numbers = #tpu.dot_dimension_numbers<[1], [0], [0], [1], [0, 0, 1, 1], [], []>} : vector<32x128xbf16>, vector<128x128xbf16>, vector<32x128xf32> -> vector<32x128xf32>
    %10 = arith.addf %1, %9 : vector<32x128xf32>
    %c0_i32_6 = arith.constant 0 : i32
    %11 = arith.addi %0, %c0_i32_6 : i32
    %c1 = arith.constant 1 : index
    %12 = arith.index_cast %11 : i32 to index
    %c0_7 = arith.constant 0 : index
    %c0_8 = arith.constant 0 : index
    %13 = vector.load %arg2[%c1, %12, %c0_7, %c0_8] : memref<4x10x16x128xbf16, #tpu.memory_space<vmem>>, vector<1x2x16x128xbf16>
    %14 = vector.shape_cast %13 : vector<1x2x16x128xbf16> to vector<2x16x128xbf16>
    %15 = vector.shape_cast %14 : vector<2x16x128xbf16> to vector<32x128xbf16>
    %c1_9 = arith.constant 1 : index
    %c0_10 = arith.constant 0 : index
    %c0_11 = arith.constant 0 : index
    %16 = vector.load %arg3[%c1_9, %c0_10, %c0_11] : memref<9x128x128xbf16, #tpu.memory_space<vmem>>, vector<1x128x128xbf16>
    %17 = vector.shape_cast %16 : vector<1x128x128xbf16> to vector<128x128xbf16>
    %cst_12 = arith.constant dense<0.000000e+00> : vector<32x128xf32>
    %18 = tpu.matmul %15, %17, %cst_12 {dimension_numbers = #tpu.dot_dimension_numbers<[1], [0], [0], [1], [0, 0, 1, 1], [], []>} : vector<32x128xbf16>, vector<128x128xbf16>, vector<32x128xf32> -> vector<32x128xf32>
    %19 = arith.addf %10, %18 : vector<32x128xf32>
    %c2 = arith.constant 2 : index
    %c0_13 = arith.constant 0 : index
    %c0_14 = arith.constant 0 : index
    %20 = vector.load %arg3[%c2, %c0_13, %c0_14] : memref<9x128x128xbf16, #tpu.memory_space<vmem>>, vector<1x128x128xbf16>
    %21 = vector.shape_cast %20 : vector<1x128x128xbf16> to vector<128x128xbf16>
    %cst_15 = arith.constant dense<0.000000e+00> : vector<32x128xf32>
    %22 = tpu.matmul %6, %21, %cst_15 {dimension_numbers = #tpu.dot_dimension_numbers<[1], [0], [0], [1], [0, 0, 1, 1], [], []>} : vector<32x128xbf16>, vector<128x128xbf16>, vector<32x128xf32> -> vector<32x128xf32>
    %c31_i32 = arith.constant 31 : i32
    %23 = tpu.dynamic_rotate %22 by %c31_i32 dim 0 : vector<32x128xf32>, i32 -> vector<32x128xf32>
    %24 = arith.addf %19, %23 : vector<32x128xf32>
    %c0_i32_16 = arith.constant 0 : i32
    %25 = arith.addi %0, %c0_i32_16 : i32
    %c2_17 = arith.constant 2 : index
    %26 = arith.index_cast %25 : i32 to index
    %c0_18 = arith.constant 0 : index
    %c0_19 = arith.constant 0 : index
    %27 = vector.load %arg2[%c2_17, %26, %c0_18, %c0_19] : memref<4x10x16x128xbf16, #tpu.memory_space<vmem>>, vector<1x2x16x128xbf16>
    %28 = vector.shape_cast %27 : vector<1x2x16x128xbf16> to vector<2x16x128xbf16>
    %29 = vector.shape_cast %28 : vector<2x16x128xbf16> to vector<32x128xbf16>
    %c3 = arith.constant 3 : index
    %c0_20 = arith.constant 0 : index
    %c0_21 = arith.constant 0 : index
    %30 = vector.load %arg3[%c3, %c0_20, %c0_21] : memref<9x128x128xbf16, #tpu.memory_space<vmem>>, vector<1x128x128xbf16>
    %31 = vector.shape_cast %30 : vector<1x128x128xbf16> to vector<128x128xbf16>
    %cst_22 = arith.constant dense<0.000000e+00> : vector<32x128xf32>
    %32 = tpu.matmul %29, %31, %cst_22 {dimension_numbers = #tpu.dot_dimension_numbers<[1], [0], [0], [1], [0, 0, 1, 1], [], []>} : vector<32x128xbf16>, vector<128x128xbf16>, vector<32x128xf32> -> vector<32x128xf32>
    %33 = arith.addf %24, %32 : vector<32x128xf32>
    %c0_i32_23 = arith.constant 0 : i32
    %34 = arith.addi %0, %c0_i32_23 : i32
    %c3_24 = arith.constant 3 : index
    %35 = arith.index_cast %34 : i32 to index
    %c0_25 = arith.constant 0 : index
    %c0_26 = arith.constant 0 : index
    %36 = vector.load %arg2[%c3_24, %35, %c0_25, %c0_26] : memref<4x10x16x128xbf16, #tpu.memory_space<vmem>>, vector<1x2x16x128xbf16>
    %37 = vector.shape_cast %36 : vector<1x2x16x128xbf16> to vector<2x16x128xbf16>
    %38 = vector.shape_cast %37 : vector<2x16x128xbf16> to vector<32x128xbf16>
    %c4 = arith.constant 4 : index
    %c0_27 = arith.constant 0 : index
    %c0_28 = arith.constant 0 : index
    %39 = vector.load %arg3[%c4, %c0_27, %c0_28] : memref<9x128x128xbf16, #tpu.memory_space<vmem>>, vector<1x128x128xbf16>
    %40 = vector.shape_cast %39 : vector<1x128x128xbf16> to vector<128x128xbf16>
    %cst_29 = arith.constant dense<0.000000e+00> : vector<32x128xf32>
    %41 = tpu.matmul %38, %40, %cst_29 {dimension_numbers = #tpu.dot_dimension_numbers<[1], [0], [0], [1], [0, 0, 1, 1], [], []>} : vector<32x128xbf16>, vector<128x128xbf16>, vector<32x128xf32> -> vector<32x128xf32>
    %42 = arith.addf %33, %41 : vector<32x128xf32>
    %c5 = arith.constant 5 : index
    %c0_30 = arith.constant 0 : index
    %c0_31 = arith.constant 0 : index
    %43 = vector.load %arg3[%c5, %c0_30, %c0_31] : memref<9x128x128xbf16, #tpu.memory_space<vmem>>, vector<1x128x128xbf16>
    %44 = vector.shape_cast %43 : vector<1x128x128xbf16> to vector<128x128xbf16>
    %cst_32 = arith.constant dense<0.000000e+00> : vector<32x128xf32>
    %45 = tpu.matmul %29, %44, %cst_32 {dimension_numbers = #tpu.dot_dimension_numbers<[1], [0], [0], [1], [0, 0, 1, 1], [], []>} : vector<32x128xbf16>, vector<128x128xbf16>, vector<32x128xf32> -> vector<32x128xf32>
    %c31_i32_33 = arith.constant 31 : i32
    %46 = tpu.dynamic_rotate %45 by %c31_i32_33 dim 0 : vector<32x128xf32>, i32 -> vector<32x128xf32>
    %47 = arith.addf %42, %46 : vector<32x128xf32>
    %c1_i32 = arith.constant 1 : i32
    %48 = arith.addi %0, %c1_i32 : i32
    %c0_34 = arith.constant 0 : index
    %49 = arith.index_cast %48 : i32 to index
    %c0_35 = arith.constant 0 : index
    %c0_36 = arith.constant 0 : index
    %50 = vector.load %arg2[%c0_34, %49, %c0_35, %c0_36] : memref<4x10x16x128xbf16, #tpu.memory_space<vmem>>, vector<1x2x16x128xbf16>
    %51 = vector.shape_cast %50 : vector<1x2x16x128xbf16> to vector<2x16x128xbf16>
    %52 = vector.shape_cast %51 : vector<2x16x128xbf16> to vector<32x128xbf16>
    %c6 = arith.constant 6 : index
    %c0_37 = arith.constant 0 : index
    %c0_38 = arith.constant 0 : index
    %53 = vector.load %arg3[%c6, %c0_37, %c0_38] : memref<9x128x128xbf16, #tpu.memory_space<vmem>>, vector<1x128x128xbf16>
    %54 = vector.shape_cast %53 : vector<1x128x128xbf16> to vector<128x128xbf16>
    %cst_39 = arith.constant dense<0.000000e+00> : vector<32x128xf32>
    %55 = tpu.matmul %52, %54, %cst_39 {dimension_numbers = #tpu.dot_dimension_numbers<[1], [0], [0], [1], [0, 0, 1, 1], [], []>} : vector<32x128xbf16>, vector<128x128xbf16>, vector<32x128xf32> -> vector<32x128xf32>
    %56 = arith.addf %47, %55 : vector<32x128xf32>
    %c1_i32_40 = arith.constant 1 : i32
    %57 = arith.addi %0, %c1_i32_40 : i32
    %c1_41 = arith.constant 1 : index
    %58 = arith.index_cast %57 : i32 to index
    %c0_42 = arith.constant 0 : index
    %c0_43 = arith.constant 0 : index
    %59 = vector.load %arg2[%c1_41, %58, %c0_42, %c0_43] : memref<4x10x16x128xbf16, #tpu.memory_space<vmem>>, vector<1x2x16x128xbf16>
    %60 = vector.shape_cast %59 : vector<1x2x16x128xbf16> to vector<2x16x128xbf16>
    %61 = vector.shape_cast %60 : vector<2x16x128xbf16> to vector<32x128xbf16>
    %c7 = arith.constant 7 : index
    %c0_44 = arith.constant 0 : index
    %c0_45 = arith.constant 0 : index
    %62 = vector.load %arg3[%c7, %c0_44, %c0_45] : memref<9x128x128xbf16, #tpu.memory_space<vmem>>, vector<1x128x128xbf16>
    %63 = vector.shape_cast %62 : vector<1x128x128xbf16> to vector<128x128xbf16>
    %cst_46 = arith.constant dense<0.000000e+00> : vector<32x128xf32>
    %64 = tpu.matmul %61, %63, %cst_46 {dimension_numbers = #tpu.dot_dimension_numbers<[1], [0], [0], [1], [0, 0, 1, 1], [], []>} : vector<32x128xbf16>, vector<128x128xbf16>, vector<32x128xf32> -> vector<32x128xf32>
    %65 = arith.addf %56, %64 : vector<32x128xf32>
    %c8 = arith.constant 8 : index
    %c0_47 = arith.constant 0 : index
    %c0_48 = arith.constant 0 : index
    %66 = vector.load %arg3[%c8, %c0_47, %c0_48] : memref<9x128x128xbf16, #tpu.memory_space<vmem>>, vector<1x128x128xbf16>
    %67 = vector.shape_cast %66 : vector<1x128x128xbf16> to vector<128x128xbf16>
    %cst_49 = arith.constant dense<0.000000e+00> : vector<32x128xf32>
    %68 = tpu.matmul %52, %67, %cst_49 {dimension_numbers = #tpu.dot_dimension_numbers<[1], [0], [0], [1], [0, 0, 1, 1], [], []>} : vector<32x128xbf16>, vector<128x128xbf16>, vector<32x128xf32> -> vector<32x128xf32>
    %c31_i32_50 = arith.constant 31 : i32
    %69 = tpu.dynamic_rotate %68 by %c31_i32_50 dim 0 : vector<32x128xf32>, i32 -> vector<32x128xf32>
    %70 = arith.addf %65, %69 : vector<32x128xf32>
    %c0_51 = arith.constant 0 : index
    %c0_52 = arith.constant 0 : index
    %71 = vector.load %arg4[%c0_51, %c0_52] : memref<1x128xf32, #tpu.memory_space<vmem>>, vector<1x128xf32>
    %72 = vector.broadcast %71 : vector<1x128xf32> to vector<32x128xf32>
    %73 = arith.addf %70, %72 : vector<32x128xf32>
    %cst_53 = arith.constant 0.000000e+00 : f32
    %74 = vector.broadcast %cst_53 : f32 to vector<32x128xf32>
    %75 = arith.maximumf %73, %74 : vector<32x128xf32>
    %76 = vector.shape_cast %75 : vector<32x128xf32> to vector<2x16x128xf32>
    %77 = vector.extract_strided_slice %76 {offsets = [0, 0, 0], sizes = [2, 8, 128], strides = [1, 1, 1]} : vector<2x16x128xf32> to vector<2x8x128xf32>
    %78 = arith.truncf %77 : vector<2x8x128xf32> to vector<2x8x128xbf16>
    %c0_54 = arith.constant 0 : index
    %c0_55 = arith.constant 0 : index
    %c0_56 = arith.constant 0 : index
    %c0_57 = arith.constant 0 : index
    %79 = vector.load %arg5[%c0_54, %c0_55, %c0_56, %c0_57] : memref<1x2x8x128xbf16, #tpu.memory_space<vmem>>, vector<1x2x8x128xbf16>
    %80 = vector.shape_cast %79 : vector<1x2x8x128xbf16> to vector<2x8x128xbf16>
    %81 = vector.shape_cast %78 : vector<2x8x128xbf16> to vector<1x2x8x128xbf16>
    tpu.vector_store %arg5[%c0_54, %c0_55, %c0_56, %c0_57], %81 {strides = array<i32>} : memref<1x2x8x128xbf16, #tpu.memory_space<vmem>>, vector<1x2x8x128xbf16>,
    return
  }
  func.func @transform_0(%arg0: i32, %arg1: i32) -> (i32, i32, i32, i32) {
    %c0_i32 = arith.constant 0 : i32
    %c0_i32_0 = arith.constant 0 : i32
    %c0_i32_1 = arith.constant 0 : i32
    %c0_i32_2 = arith.constant 0 : i32
    return %arg0, %c0_i32, %c0_i32_0, %c0_i32_1 : i32, i32, i32, i32
  }
  func.func @transform_1(%arg0: i32, %arg1: i32) -> (i32, i32, i32) {
    %c0_i32 = arith.constant 0 : i32
    %c0_i32_0 = arith.constant 0 : i32
    %c0_i32_1 = arith.constant 0 : i32
    %c0_i32_2 = arith.constant 0 : i32
    return %c0_i32, %c0_i32_0, %c0_i32_1 : i32, i32, i32
  }
  func.func @transform_2(%arg0: i32, %arg1: i32) -> (i32, i32) {
    %c0_i32 = arith.constant 0 : i32
    %c0_i32_0 = arith.constant 0 : i32
    %c0_i32_1 = arith.constant 0 : i32
    return %c0_i32, %c0_i32_0 : i32, i32
  }
  func.func @transform_3(%arg0: i32, %arg1: i32) -> (i32, i32, i32, i32) {
    %c0_i32 = arith.constant 0 : i32
    %c0_i32_0 = arith.constant 0 : i32
    %c0_i32_1 = arith.constant 0 : i32
    return %arg0, %arg1, %c0_i32, %c0_i32_0 : i32, i32, i32, i32
  }
}

module attributes {stable_mosaic.version = 11 : i64} {
  func.func @_matmul2_bias_relu_kernel(%arg0: i32, %arg1: memref<32x128xbf16, #tpu.memory_space<vmem>>, %arg2: memref<128x128xbf16, #tpu.memory_space<vmem>>, %arg3: memref<32x128xbf16, #tpu.memory_space<vmem>>, %arg4: memref<128x128xbf16, #tpu.memory_space<vmem>>, %arg5: memref<1x128xf32, #tpu.memory_space<vmem>>, %arg6: memref<32x128xbf16, #tpu.memory_space<vmem>>) attributes {dimension_semantics = [#tpu.dimension_semantics<parallel>], iteration_bounds = array<i64: 4>, scalar_prefetch = 0 : i64, scratch_operands = 0 : i64, tpu.core_type = #tpu.core_type<tc>, window_params = [{transform_indices = @transform_0, window_bounds = array<i64: 32, 128>}, {pipeline_mode = #tpu.pipeline_mode<synchronous>, transform_indices = @transform_1, window_bounds = array<i64: 128, 128>}, {transform_indices = @transform_2, window_bounds = array<i64: 32, 128>}, {pipeline_mode = #tpu.pipeline_mode<synchronous>, transform_indices = @transform_3, window_bounds = array<i64: 128, 128>}, {pipeline_mode = #tpu.pipeline_mode<synchronous>, transform_indices = @transform_4, window_bounds = array<i64: 1, 128>}, {transform_indices = @transform_5, window_bounds = array<i64: 32, 128>}]} {
    %c0 = arith.constant 0 : index
    %c0_0 = arith.constant 0 : index
    %0 = vector.load %arg1[%c0, %c0_0] : memref<32x128xbf16, #tpu.memory_space<vmem>>, vector<32x128xbf16>
    %c0_1 = arith.constant 0 : index
    %c0_2 = arith.constant 0 : index
    %1 = vector.load %arg2[%c0_1, %c0_2] : memref<128x128xbf16, #tpu.memory_space<vmem>>, vector<128x128xbf16>
    %cst = arith.constant dense<0.000000e+00> : vector<32x128xf32>
    %2 = tpu.matmul %0, %1, %cst {dimension_numbers = #tpu.dot_dimension_numbers<[1], [0], [0], [1], [0, 0, 1, 1], [], []>} : vector<32x128xbf16>, vector<128x128xbf16>, vector<32x128xf32> -> vector<32x128xf32>
    %c0_3 = arith.constant 0 : index
    %c0_4 = arith.constant 0 : index
    %3 = vector.load %arg3[%c0_3, %c0_4] : memref<32x128xbf16, #tpu.memory_space<vmem>>, vector<32x128xbf16>
    %c0_5 = arith.constant 0 : index
    %c0_6 = arith.constant 0 : index
    %4 = vector.load %arg4[%c0_5, %c0_6] : memref<128x128xbf16, #tpu.memory_space<vmem>>, vector<128x128xbf16>
    %cst_7 = arith.constant dense<0.000000e+00> : vector<32x128xf32>
    %5 = tpu.matmul %3, %4, %cst_7 {dimension_numbers = #tpu.dot_dimension_numbers<[1], [0], [0], [1], [0, 0, 1, 1], [], []>} : vector<32x128xbf16>, vector<128x128xbf16>, vector<32x128xf32> -> vector<32x128xf32>
    %6 = arith.addf %2, %5 : vector<32x128xf32>
    %c0_8 = arith.constant 0 : index
    %c0_9 = arith.constant 0 : index
    %7 = vector.load %arg5[%c0_8, %c0_9] : memref<1x128xf32, #tpu.memory_space<vmem>>, vector<1x128xf32>
    %8 = vector.broadcast %7 : vector<1x128xf32> to vector<32x128xf32>
    %9 = arith.addf %6, %8 : vector<32x128xf32>
    %cst_10 = arith.constant 0.000000e+00 : f32
    %10 = vector.broadcast %cst_10 : f32 to vector<32x128xf32>
    %11 = arith.maximumf %9, %10 : vector<32x128xf32>
    %12 = arith.truncf %11 : vector<32x128xf32> to vector<32x128xbf16>
    %c0_11 = arith.constant 0 : index
    %c0_12 = arith.constant 0 : index
    %13 = vector.load %arg6[%c0_11, %c0_12] : memref<32x128xbf16, #tpu.memory_space<vmem>>, vector<32x128xbf16>
    tpu.vector_store %arg6[%c0_11, %c0_12], %12 {strides = array<i32>} : memref<32x128xbf16, #tpu.memory_space<vmem>>, vector<32x128xbf16>,
    return
  }
  func.func @transform_0(%arg0: i32) -> (i32, i32) {
    %c0_i32 = arith.constant 0 : i32
    %c0_i32_0 = arith.constant 0 : i32
    return %arg0, %c0_i32 : i32, i32
  }
  func.func @transform_1(%arg0: i32) -> (i32, i32) {
    %c0_i32 = arith.constant 0 : i32
    %c0_i32_0 = arith.constant 0 : i32
    %c0_i32_1 = arith.constant 0 : i32
    return %c0_i32, %c0_i32_0 : i32, i32
  }
  func.func @transform_2(%arg0: i32) -> (i32, i32) {
    %c0_i32 = arith.constant 0 : i32
    %c0_i32_0 = arith.constant 0 : i32
    return %arg0, %c0_i32 : i32, i32
  }
  func.func @transform_3(%arg0: i32) -> (i32, i32) {
    %c0_i32 = arith.constant 0 : i32
    %c0_i32_0 = arith.constant 0 : i32
    %c0_i32_1 = arith.constant 0 : i32
    return %c0_i32, %c0_i32_0 : i32, i32
  }
  func.func @transform_4(%arg0: i32) -> (i32, i32) {
    %c0_i32 = arith.constant 0 : i32
    %c0_i32_0 = arith.constant 0 : i32
    %c0_i32_1 = arith.constant 0 : i32
    return %c0_i32, %c0_i32_0 : i32, i32
  }
  func.func @transform_5(%arg0: i32) -> (i32, i32) {
    %c0_i32 = arith.constant 0 : i32
    %c0_i32_0 = arith.constant 0 : i32
    return %arg0, %c0_i32 : i32, i32
  }
}

</mosaic_0001>

<bundles_post_ra>
// kernel: bottleneck_forward.3
= control target key start
LH: loop header
LB: loop body
LE: loop exit
PB: predicated region body
PF: predicated region fallthrough
CT: control target
= control target key end

     0   :  { %s782_s12 = smov 0   ;;  %s853_s0 = inlined_call_operand.vmem [shape: bf16[512,128], index: 0, kind: input, shape index: {}]   ;;  %s854_s1 = inlined_call_operand.vmem [shape: bf16[128,128], index: 1, kind: input, shape index: {}]   ;;  %s855_s2 = inlined_call_operand.vmem [shape: f32[1,128], index: 2, kind: input, shape index: {}]   ;;  %s856_s3 = inlined_call_operand.vmem [shape: bf16[512,128], index: 3, kind: output, shape index: {}]  }
   0x1 LB: > { %s559_s13 = sadd.s32 4294967295, %s760_s12   ;;  %p563_p0 = scmp.ge.s32.totalorder %s760_s12, 1  ;;  %s760_s12 = sphi %s782_s12, %s13_s12  }
   0x2   : > { %p138_p1 = scmp.lt.s32.totalorder %s760_s12, 5 }
   0x4   : > { %p139_p2 = pnand %p563_p0, %p138_p1 }
   0x5   : > { %v738_v0 = vld [vmem:[%s854_s1] sm:$0xff] (!%p139_p2)   ;;  %s564_s16 = sshll.u32 (!%p139_p2), %s559_s13, 4  ;;  %v739_v1 = vld [vmem:[%s854_s1 + $0x8] sm:$0xff] (!%p139_p2)   ;;  %v740_v2 = vld [vmem:[%s854_s1 + $0x10] sm:$0xff] (!%p139_p2)  }
   0x6   : > { %142 = sbr.rel (%p139_p2) target bundleno = 268 (0x10c), region = 32  ;;  %p163_p3 = scmp.lt.s32.totalorder (!%p139_p2), %s564_s16, 63  ;;  %682 = vmatprep.subr.bf16.mxu0 (!%p139_p2), %v738_v0  ;;  %714 = vmatprep.subr.bf16.mxu1 (!%p139_p2), %v738_v0  ;;  %v741_v3 = vld [vmem:[%s854_s1 + $0x18] sm:$0xff] (!%p139_p2)   ;;  %v742_v6 = vld [vmem:[%s854_s1 + $0x20] sm:$0xff] (!%p139_p2)   ;;  %v743_v7 = vld [vmem:[%s854_s1 + $0x28] sm:$0xff] (!%p139_p2)  }
   0x7   : > { %683 = vmatpush3.bf16.msra.mxu0 (!%p139_p2), %v738_v0  ;;  %722 = vmatpush3.bf16.msra.mxu1 (!%p139_p2), %v738_v0  ;;  %v744_v8 = vld [vmem:[%s854_s1 + $0x30] sm:$0xff] (!%p139_p2)   ;;  %v745_v9 = vld [vmem:[%s854_s1 + $0x38] sm:$0xff] (!%p139_p2)   ;;  %v568_v16 = vld [vmem:[%s855_s2] ss:$0 sm:$0xff] (!%p139_p2) }
   0x8   : > { %684 = vmatprep.subr.bf16.mxu0 (!%p139_p2), %v739_v1  ;;  %715 = vmatprep.subr.bf16.mxu1 (!%p139_p2), %v739_v1 }
   0xb   : > { %685 = vmatpush3.bf16.msra.mxu0 (!%p139_p2), %v739_v1  ;;  %723 = vmatpush3.bf16.msra.mxu1 (!%p139_p2), %v739_v1 }
   0xc   : > { %686 = vmatprep.subr.bf16.mxu0 (!%p139_p2), %v740_v2  ;;  %716 = vmatprep.subr.bf16.mxu1 (!%p139_p2), %v740_v2 }
   0xd   : > { %s858_s16 = smov (!%p163_p3, %s564_s16), 63 }
   0xe   : > { %s565_s21 = sshll.u32 %s858_s16, 2 }
   0xf   : > { %s807_s24 = scalar_lea.vmem %s853_s0, %s565_s21  ;;  %687 = vmatpush3.bf16.msra.mxu0 %v740_v2  ;;  %724 = vmatpush3.bf16.msra.mxu1 %v740_v2  ;;  %s840_s13 = scalar_lea.vmem %s856_s3, %s565_s21 }
  0x10   : > { %v746_v4 = vld [vmem:[%s807_s24] sm:$0xff]   ;;  %688 = vmatprep.subr.bf16.mxu0 %v741_v3  ;;  %717 = vmatprep.subr.bf16.mxu1 %v741_v3  ;;  %v748_v10 = vld [vmem:[%s807_s24 + $0x8] sm:$0xff]   ;;  %v750_v12 = vld [vmem:[%s807_s24 + $0x10] sm:$0xff]  }
  0x11   : > { %v747_v5 = vld [vmem:[%s807_s24 + $0x20] sm:$0xff]   ;;  %698 = vmatprep.mubr.bf16.mxu0 %v746_v4  ;;  %v749_v11 = vld [vmem:[%s807_s24 + $0x28] sm:$0xff]   ;;  %v751_v13 = vld [vmem:[%s807_s24 + $0x30] sm:$0xff]  }
  0x12   : > { %706 = vmatprep.mubr.bf16.mxu1 %v747_v5  ;;  %v752_v14 = vld [vmem:[%s807_s24 + $0x18] sm:$0xff]  }
  0x13   : > { %689 = vmatpush3.bf16.msra.mxu0 %v741_v3  ;;  %725 = vmatpush3.bf16.msra.mxu1 %v741_v3  ;;  %v753_v15 = vld [vmem:[%s807_s24 + $0x38] sm:$0xff]  }
  0x14   : > { %690 = vmatprep.subr.bf16.mxu0 %v742_v6  ;;  %718 = vmatprep.subr.bf16.mxu1 %v742_v6 }
  0x17   : > { %691 = vmatpush3.bf16.msra.mxu0 %v742_v6  ;;  %726 = vmatpush3.bf16.msra.mxu1 %v742_v6 }
  0x18   : > { %692 = vmatprep.subr.bf16.mxu0 %v743_v7  ;;  %719 = vmatprep.subr.bf16.mxu1 %v743_v7 }
  0x1b   : > { %693 = vmatpush3.bf16.msra.mxu0 %v743_v7  ;;  %727 = vmatpush3.bf16.msra.mxu1 %v743_v7 }
  0x1c   : > { %694 = vmatprep.subr.bf16.mxu0 %v744_v8  ;;  %720 = vmatprep.subr.bf16.mxu1 %v744_v8 }
  0x1f   : > { %695 = vmatpush3.bf16.msra.mxu0 %v744_v8  ;;  %728 = vmatpush3.bf16.msra.mxu1 %v744_v8 }
  0x20   : > { %696 = vmatprep.subr.bf16.mxu0 %v745_v9  ;;  %721 = vmatprep.subr.bf16.mxu1 %v745_v9 }
  0x23   : > { %697 = vmatpush3.bf16.msra.mxu0 %v745_v9  ;;  %729 = vmatpush3.bf16.msra.mxu1 %v745_v9 }
  0x26   : > { %699 = vmatmul.mubr.bf16.vlgmr.msra.gmra.mrb[0].mxu0 %v748_v10  ;;  %707 = vmatmul.mubr.bf16.vlgmr.msra.gmra.mrb[0].mxu1 %v749_v11 }
  0x27   : > { %702 = vmatprep.mubr.bf16.mxu0 %v750_v12  ;;  %710 = vmatprep.mubr.bf16.mxu1 %v751_v13 }
  0x2e   : > { %703 = vmatmul.mubr.bf16.gmra.mrb[4].mxu0 %v752_v14  ;;  %711 = vmatmul.mubr.bf16.gmra.mrb[4].mxu1 %v753_v15 }
  0xf9   : > { %v700_v17 = vpop.f32.mrb[0].mxu0  ;;  %v708_v18 = vpop.f32.mrb[0].mxu1 }
  0xfa   : > { %v353_v19 = vadd.f32 %v700_v17, %v568_v16  ;;  %v385_v20 = vadd.f32 %v708_v18, %v568_v16  ;;  %v344_v21 = vpop.f32.mrb[1].mxu0  ;;  %v376_v22 = vpop.f32.mrb[1].mxu1 }
  0xfb   : > { %v345_v23 = vadd.f32 %v568_v16, %v344_v21  ;;  %v377_v24 = vadd.f32 %v568_v16, %v376_v22  ;;  %v701_v25 = vpop.f32.mrb[2].mxu0  ;;  %v709_v26 = vpop.f32.mrb[2].mxu1 }
  0xfc   : > { %v356_v27 = vadd.f32 %v701_v25, %v568_v16  ;;  %v388_v28 = vadd.f32 %v709_v26, %v568_v16  ;;  %v347_v29 = vpop.f32.mrb[3].mxu0  ;;  %v379_v30 = vpop.f32.mrb[3].mxu1  ;;  %v409_v33 = vmax.f32 %v353_v19, 0.0  ;;  %v417_v34 = vmax.f32 %v385_v20, 0.0 }
  0xfd   : > { %v348_v31 = vadd.f32 %v568_v16, %v347_v29  ;;  %v380_v32 = vadd.f32 %v568_v16, %v379_v30  ;;  %v407_v37 = vmax.f32 %v345_v23, 0.0  ;;  %v415_v38 = vmax.f32 %v377_v24, 0.0 }
  0xfe   : > { %v410_v35 = vmax.f32 %v356_v27, 0.0  ;;  %v418_v36 = vmax.f32 %v388_v28, 0.0 }
  0xff   : > { %v408_v39 = vmax.f32 %v348_v31, 0.0  ;;  %v416_v40 = vmax.f32 %v380_v32, 0.0 }
 0x100   : > { %v627_v41 = vpack.c.bf16 %v410_v35, %v409_v33  ;;  %v647_v42 = vpack.c.bf16 %v418_v36, %v417_v34 }
 0x101   : > { %v622_v43 = vpack.c.bf16 %v408_v39, %v407_v37  ;;  %v642_v44 = vpack.c.bf16 %v416_v40, %v415_v38  ;;  %v704_v45 = vpop.f32.mrb[4].mxu0  ;;  %v712_v46 = vpop.f32.mrb[4].mxu1 }
 0x102   : > { %659 = vst [vmem:[%s840_s13 + $0x8] sm:$0xff] %v627_v41   ;;  %663 = vst [vmem:[%s840_s13 + $0x28] sm:$0xff] %v647_v42   ;;  %v369_v47 = vadd.f32 %v704_v45, %v568_v16  ;;  %v401_v48 = vadd.f32 %v712_v46, %v568_v16  ;;  %v360_v49 = vpop.f32.mrb[5].mxu0  ;;  %v392_v50 = vpop.f32.mrb[5].mxu1 }
 0x103   : > { %623 = vst [vmem:[%s840_s13] sm:$0xff] %v622_v43   ;;  %662 = vst [vmem:[%s840_s13 + $0x20] sm:$0xff] %v642_v44   ;;  %v361_v51 = vadd.f32 %v568_v16, %v360_v49  ;;  %v393_v52 = vadd.f32 %v568_v16, %v392_v50  ;;  %v705_v53 = vpop.f32.mrb[6].mxu0  ;;  %v713_v54 = vpop.f32.mrb[6].mxu1 }
 0x104   : > { %v372_v55 = vadd.f32 %v705_v53, %v568_v16  ;;  %v404_v56 = vadd.f32 %v713_v54, %v568_v16  ;;  %v363_v57 = vpop.f32.mrb[7].mxu0  ;;  %v395_v58 = vpop.f32.mrb[7].mxu1  ;;  %v413_v61 = vmax.f32 %v369_v47, 0.0  ;;  %v421_v62 = vmax.f32 %v401_v48, 0.0 }
 0x105   : > { %v364_v59 = vadd.f32 %v568_v16, %v363_v57  ;;  %v396_v60 = vadd.f32 %v568_v16, %v395_v58  ;;  %v411_v1 = vmax.f32 %v361_v51, 0.0  ;;  %v419_v2 = vmax.f32 %v393_v52, 0.0 }
 0x106   : > { %v414_v63 = vmax.f32 %v372_v55, 0.0  ;;  %v422_v0 = vmax.f32 %v404_v56, 0.0 }
 0x107   : > { %v412_v3 = vmax.f32 %v364_v59, 0.0  ;;  %v420_v4 = vmax.f32 %v396_v60, 0.0 }
 0x108   : > { %v637_v5 = vpack.c.bf16 %v414_v63, %v413_v61  ;;  %v657_v6 = vpack.c.bf16 %v422_v0, %v421_v62 }
 0x109   : > { %v632_v7 = vpack.c.bf16 %v412_v3, %v411_v1  ;;  %v652_v8 = vpack.c.bf16 %v420_v4, %v419_v2 }
 0x10a   : > { %661 = vst [vmem:[%s840_s13 + $0x18] sm:$0xff] %v637_v5   ;;  %665 = vst [vmem:[%s840_s13 + $0x38] sm:$0xff] %v657_v6  }
 0x10b   : > { %660 = vst [vmem:[%s840_s13 + $0x10] sm:$0xff] %v632_v7   ;;  %664 = vst [vmem:[%s840_s13 + $0x30] sm:$0xff] %v652_v8  }
 0x10c PF: > { %s13_s12 = sadd.s32 1, %s760_s12  }
 0x10d   : > { %p10_p4 = scmp.ge.s32.totalorder %s13_s12, 6  }
 0x10f   :  { %12 = sbr.rel (!%p10_p4) target bundleno = 1 (0x1), region = 62 }

// kernel: bottleneck_forward.4
= control target key start
LH: loop header
LB: loop body
LE: loop exit
PB: predicated region body
PF: predicated region fallthrough
CT: control target
= control target key end

     0   :  { %s2213_s12 = smov 0   ;;  %s2215_s13 = smov 0   ;;  %s2525_s0 = inlined_call_operand.vmem [shape: bf16[8,10,16,128], index: 0, kind: input, shape index: {}]   ;;  %s2526_s1 = inlined_call_operand.vmem [shape: bf16[9,128,128], index: 1, kind: input, shape index: {}]   ;;  %s2527_s2 = inlined_call_operand.vmem [shape: f32[1,128], index: 2, kind: input, shape index: {}]   ;;  %s2528_s3 = inlined_call_operand.vmem [shape: bf16[2,8,8,128], index: 3, kind: output, shape index: {}]  }
   0x1   :  { %s2217_s14 = smov 0   ;;  %s2219_s15 = smov 0  }
   0x2   :  { %s2221_s16 = smov 0  }
   0x3 LB: > { %s22_s17 = sadd.s32 1, %s2183_s14  ;;  %s25_s18 = sadd.s32 1, %s2187_s15  ;;  %s2191_s16 = sphi %s2221_s16, %s13_s16   ;;  %s2187_s15 = sphi %s2219_s15, %s2532_s15   ;;  %s2183_s14 = sphi %s2217_s14, %s2531_s14   ;;  %s2179_s13 = sphi %s2215_s13, %s2530_s13   ;;  %s2175_s12 = sphi %s2213_s12, %s2529_s12  }
   0x4   : > { %p23_p0 = scmp.ge.s32.totalorder %s22_s17, 4  ;;  %p1490_p1 = scmp.ge.s32.totalorder %s2191_s16, 1 }
   0x5   : > { %p153_p2 = scmp.lt.s32.totalorder %s2191_s16, 9 }
   0x6   : > { %s2534_s17 = smov (%p23_p0, %s22_s17), 0  ;;  %s2536_s18 = smov (!%p23_p0, %s25_s18), %s2187_s15 }
   0x7   : > { %p154_p3 = pnand %p1490_p1, %p153_p2  ;;  %p27_p4 = scmp.ge.s32.totalorder %s2536_s18, 2 }
   0x8   : > { %v2069_v0 = vld [vmem:[%s2526_s1 + $0x40] sm:$0xff] (!%p154_p3)   ;;  %s1491_s21 = sshll.u32 (!%p154_p3), %s2179_s13, 2  ;;  %v2071_v2 = vld [vmem:[%s2526_s1 + $0x48] sm:$0xff] (!%p154_p3)   ;;  %v2073_v4 = vld [vmem:[%s2526_s1 + $0x50] sm:$0xff] (!%p154_p3)   ;;  %s1746_s20 = sshll.u32 (!%p154_p3), %s2175_s12, 4 }
   0x9   : > { %s2538_s18 = smov (%p27_p4, %s2536_s18), 0  ;;  %157 = sbr.rel (%p154_p3) target bundleno = 397 (0x18d), region = 32 }
   0xa   : > { %v2070_v1 = vld [vmem:[%s2526_s1] sm:$0xff] (!%p154_p3)   ;;  %p183_p5 = scmp.lt.s32.totalorder (!%p154_p3), %s1491_s21, 7  ;;  %1848 = vmatprep.subr.bf16.mxu0 (!%p154_p3), %v2069_v0  ;;  %v2072_v3 = vld [vmem:[%s2526_s1 + $0x8] sm:$0xff] (!%p154_p3)   ;;  %v2074_v5 = vld [vmem:[%s2526_s1 + $0x10] sm:$0xff] (!%p154_p3)   ;;  %s1493_s8 = sshll.u32 (!%p154_p3), %s2175_s12, 1 }
   0xb   : > { %1868 = vmatprep.subr.bf16.mxu1 (!%p154_p3), %v2070_v1  ;;  %1849 = vmatpush3.bf16.msra.mxu0 (!%p154_p3), %v2069_v0  ;;  %v2075_v6 = vld [vmem:[%s2526_s1 + $0x58] sm:$0xff] (!%p154_p3)   ;;  %v2077_v8 = vld [vmem:[%s2526_s1 + $0x60] sm:$0xff] (!%p154_p3)   ;;  %v2079_v10 = vld [vmem:[%s2526_s1 + $0x68] sm:$0xff] (!%p154_p3)   ;;  %p190_p6 = scmp.lt.s32.totalorder (!%p154_p3), %s2179_s13, 1  ;;  %p192_p7 = scmp.lt.s32.totalorder (!%p154_p3), %s1493_s8, 7 }
   0xc   : > { %1869 = vmatpush3.bf16.msra.mxu1 (!%p154_p3), %v2070_v1  ;;  %1850 = vmatprep.subr.bf16.mxu0 (!%p154_p3), %v2071_v2  ;;  %v2076_v7 = vld [vmem:[%s2526_s1 + $0x18] sm:$0xff] (!%p154_p3)   ;;  %v2078_v9 = vld [vmem:[%s2526_s1 + $0x20] sm:$0xff] (!%p154_p3)   ;;  %v2080_v11 = vld [vmem:[%s2526_s1 + $0x28] sm:$0xff] (!%p154_p3)  }
   0xd   : > { %1870 = vmatprep.subr.bf16.mxu1 (!%p154_p3), %v2072_v3  ;;  %v2081_v14 = vld [vmem:[%s2526_s1 + $0x70] sm:$0xff] (!%p154_p3)   ;;  %v2083_v16 = vld [vmem:[%s2526_s1 + $0x78] sm:$0xff] (!%p154_p3)   ;;  %v2089_v18 = vld [vmem:[%s2526_s1 + $0x80] sm:$0xff] (!%p154_p3)  }
   0xe   : > { %v2082_v15 = vld [vmem:[%s2526_s1 + $0x30] sm:$0xff] (!%p154_p3)   ;;  %v2084_v17 = vld [vmem:[%s2526_s1 + $0x38] sm:$0xff] (!%p154_p3)   ;;  %v2090_v19 = vld [vmem:[%s2526_s1 + $0xc0] sm:$0xff] (!%p154_p3)  }
   0xf   : > { %1851 = vmatpush3.bf16.msra.mxu0 (!%p154_p3), %v2071_v2  ;;  %v2091_v22 = vld [vmem:[%s2526_s1 + $0x88] sm:$0xff] (!%p154_p3)   ;;  %v2093_v24 = vld [vmem:[%s2526_s1 + $0x90] sm:$0xff] (!%p154_p3)   ;;  %v2095_v27 = vld [vmem:[%s2526_s1 + $0x98] sm:$0xff] (!%p154_p3)  }
  0x10   : > { %s2540_s21 = smov (!%p183_p5, %s1491_s21), 7  ;;  %1871 = vmatpush3.bf16.msra.mxu1 %v2072_v3  ;;  %1852 = vmatprep.subr.bf16.mxu0 %v2073_v4  ;;  %v2092_v23 = vld [vmem:[%s2526_s1 + $0xc8] sm:$0xff]   ;;  %v2094_v26 = vld [vmem:[%s2526_s1 + $0xd0] sm:$0xff]   ;;  %v2096_v28 = vld [vmem:[%s2526_s1 + $0xd8] sm:$0xff]   ;;  %s2542_s13 = smov (!%p190_p6, %s2179_s13), 1 }
  0x11   : > { %s2028_s5 = smul.u32 80, %s2540_s21  ;;  %1872 = vmatprep.subr.bf16.mxu1 %v2074_v5  ;;  %v2097_v29 = vld [vmem:[%s2526_s1 + $0xa0] sm:$0xff]   ;;  %v2099_v31 = vld [vmem:[%s2526_s1 + $0xa8] sm:$0xff]   ;;  %v2101_v33 = vld [vmem:[%s2526_s1 + $0xb0] sm:$0xff]   ;;  %s2544_s8 = smov (!%p192_p7, %s1493_s8), 7 }
  0x12   : > { %v2098_v30 = vld [vmem:[%s2526_s1 + $0xe0] sm:$0xff]   ;;  %v2100_v32 = vld [vmem:[%s2526_s1 + $0xe8] sm:$0xff]   ;;  %v2102_v34 = vld [vmem:[%s2526_s1 + $0xf0] sm:$0xff]   ;;  %s1494_s9 = sshll.u32 %s2542_s13, 3 }
  0x13   : > { %s187_s19 = scalar_lea.vmem %s2525_s0, %s2028_s5  ;;  %1853 = vmatpush3.bf16.msra.mxu0 %v2073_v4  ;;  %v2103_v35 = vld [vmem:[%s2526_s1 + $0xb8] sm:$0xff]   ;;  %v2106_v37 = vld [vmem:[%s2526_s1 + $0x100] sm:$0xff]   ;;  %v2109_v40 = vld [vmem:[%s2526_s1 + $0x108] sm:$0xff]   ;;  %s195_s12 = sadd.s32 %s1494_s9, %s2544_s8 }
  0x14   : > { %1873 = vmatpush3.bf16.msra.mxu1 %v2074_v5  ;;  %1854 = vmatprep.subr.bf16.mxu0 %v2075_v6  ;;  %s2282_s25 = scalar_lea.vmem %s187_s19, %s1746_s20  ;;  %v2104_v36 = vld [vmem:[%s2526_s1 + $0xf8] sm:$0xff]   ;;  %v2107_v38 = vld [vmem:[%s2526_s1 + $0x140] sm:$0xff]   ;;  %v2110_v41 = vld [vmem:[%s2526_s1 + $0x148] sm:$0xff]   ;;  %s1495_s19 = sshll.u32 %s195_s12, 2 }
  0x15   : > { %1874 = vmatprep.subr.bf16.mxu1 %v2076_v7  ;;  %v2085_v12 = vld [vmem:[%s2282_s25 + $0x50] sm:$0xff]   ;;  %v2086_v13 = vld [vmem:[%s2282_s25] sm:$0xff]   ;;  %v2087_v20 = vld [vmem:[%s2282_s25 + $0x58] sm:$0xff]   ;;  %s197_s21 = scalar_lea.vmem %s2528_s3, %s1495_s19 }
  0x16   : > { %1864 = vmatprep.mubr.bf16.mxu0 %v2085_v12  ;;  %1884 = vmatprep.mubr.bf16.mxu1 %v2086_v13  ;;  %v2088_v21 = vld [vmem:[%s2282_s25 + $0x8] sm:$0xff]   ;;  %v2105_v25 = vld [vmem:[%s2282_s25 + $0xa0] sm:$0xff]   ;;  %v2123_v42 = vld [vmem:[%s2282_s25 + $0xf0] sm:$0xff]  }
  0x17   : > { %1855 = vmatpush3.bf16.msra.mxu0 %v2075_v6  ;;  %v2362_v39 = vld [vmem:[%s2282_s25 + $0xa8] sm:$0xff]   ;;  %v2111_v43 = vld [vmem:[%s2526_s1 + $0x110] sm:$0xff]   ;;  %v2113_v45 = vld [vmem:[%s2526_s1 + $0x118] sm:$0xff]  }
  0x18   : > { %1875 = vmatpush3.bf16.msra.mxu1 %v2076_v7  ;;  %1856 = vmatprep.subr.bf16.mxu0 %v2077_v8  ;;  %v2112_v44 = vld [vmem:[%s2526_s1 + $0x150] sm:$0xff]   ;;  %v2114_v46 = vld [vmem:[%s2526_s1 + $0x158] sm:$0xff]   ;;  %v2115_v47 = vld [vmem:[%s2526_s1 + $0x120] sm:$0xff]  }
  0x19   : > { %1876 = vmatprep.subr.bf16.mxu1 %v2078_v9  ;;  %v2116_v48 = vld [vmem:[%s2526_s1 + $0x160] sm:$0xff]   ;;  %v2117_v49 = vld [vmem:[%s2526_s1 + $0x128] sm:$0xff]   ;;  %v2119_v51 = vld [vmem:[%s2526_s1 + $0x130] sm:$0xff]  }
  0x1a   : > { %v2118_v50 = vld [vmem:[%s2526_s1 + $0x168] sm:$0xff]   ;;  %v2120_v52 = vld [vmem:[%s2526_s1 + $0x170] sm:$0xff]   ;;  %v2121_v53 = vld [vmem:[%s2526_s1 + $0x138] sm:$0xff]  }
  0x1b   : > { %1857 = vmatpush3.bf16.msra.mxu0 %v2077_v8  ;;  %v2122_v54 = vld [vmem:[%s2526_s1 + $0x178] sm:$0xff]   ;;  %v2125_v55 = vld [vmem:[%s2526_s1 + $0x180] sm:$0xff]   ;;  %v2127_v58 = vld [vmem:[%s2526_s1 + $0x188] sm:$0xff]  }
  0x1c   : > { %1877 = vmatpush3.bf16.msra.mxu1 %v2078_v9  ;;  %1858 = vmatprep.subr.bf16.mxu0 %v2079_v10  ;;  %v2126_v56 = vld [vmem:[%s2526_s1 + $0x1c0] sm:$0xff]   ;;  %v2124_v57 = vld [vmem:[%s2282_s25 + $0xf8] sm:$0xff]   ;;  %v2128_v59 = vld [vmem:[%s2526_s1 + $0x1c8] sm:$0xff]  }
  0x1d   : > { %1878 = vmatprep.subr.bf16.mxu1 %v2080_v11  ;;  %v2141_v60 = vld [vmem:[%s2282_s25 + $0x8] sm:$0xff]   ;;  %v2144_v61 = vld [vmem:[%s2282_s25 + $0x58] sm:$0xff]   ;;  %v2129_v62 = vld [vmem:[%s2526_s1 + $0x190] sm:$0xff]  }
  0x1e   : > { %v2130_v63 = vld [vmem:[%s2526_s1 + $0x1d0] sm:$0xff]   ;;  %v2131_v0 = vld [vmem:[%s2526_s1 + $0x198] sm:$0xff]   ;;  %v2133_v2 = vld [vmem:[%s2526_s1 + $0x1a0] sm:$0xff]  }
  0x1f   : > { %1859 = vmatpush3.bf16.msra.mxu0 %v2079_v10  ;;  %v2132_v1 = vld [vmem:[%s2526_s1 + $0x1d8] sm:$0xff]   ;;  %v2134_v3 = vld [vmem:[%s2526_s1 + $0x1e0] sm:$0xff]   ;;  %v2135_v4 = vld [vmem:[%s2526_s1 + $0x1a8] sm:$0xff]  }
  0x20   : > { %1879 = vmatpush3.bf16.msra.mxu1 %v2080_v11  ;;  %1860 = vmatprep.subr.bf16.mxu0 %v2081_v14  ;;  %v2136_v5 = vld [vmem:[%s2526_s1 + $0x1e8] sm:$0xff]   ;;  %v2137_v6 = vld [vmem:[%s2526_s1 + $0x1b0] sm:$0xff]   ;;  %v2139_v8 = vld [vmem:[%s2526_s1 + $0x1b8] sm:$0xff]  }
  0x21   : > { %1880 = vmatprep.subr.bf16.mxu1 %v2082_v15  ;;  %v2138_v7 = vld [vmem:[%s2526_s1 + $0x1f0] sm:$0xff]   ;;  %v2140_v9 = vld [vmem:[%s2526_s1 + $0x1f8] sm:$0xff]   ;;  %v2143_v10 = vld [vmem:[%s2526_s1 + $0x200] sm:$0xff]  }
  0x22   : > { %v2142_v11 = vld [vmem:[%s2282_s25 + $0x10] sm:$0xff]   ;;  %v2145_v12 = vld [vmem:[%s2282_s25 + $0x60] sm:$0xff]  }
  0x23   : > { %1861 = vmatpush3.bf16.msra.mxu0 %v2081_v14  ;;  %v2147_v14 = vld [vmem:[%s2526_s1 + $0x210] sm:$0xff]  }
  0x24   : > { %1881 = vmatpush3.bf16.msra.mxu1 %v2082_v15  ;;  %1862 = vmatprep.subr.bf16.mxu0 %v2083_v16  ;;  %v2148_v15 = vld [vmem:[%s2526_s1 + $0x218] sm:$0xff]  }
  0x25   : > { %1882 = vmatprep.subr.bf16.mxu1 %v2084_v17 }
  0x27   : > { %1863 = vmatpush3.bf16.msra.mxu0 %v2083_v16  ;;  %v2149_v16 = vld [vmem:[%s2526_s1 + $0x220] sm:$0xff]  }
  0x28   : > { %1883 = vmatpush3.bf16.msra.mxu1 %v2084_v17  ;;  %1888 = vmatprep.subr.bf16.mxu0 %v2089_v18  ;;  %v2150_v17 = vld [vmem:[%s2526_s1 + $0x228] sm:$0xff]  }
  0x29   : > { %1908 = vmatprep.subr.bf16.mxu1 %v2090_v19 }
  0x2a   : > { %1865 = vmatmul.mubr.bf16.vlgmr.msra.gmra.mrb[0].mxu0 %v2087_v20 }
  0x2b   : > { %1885 = vmatmul.mubr.bf16.vlgmr.msra.gmra.mrb[0].mxu1 %v2088_v21  ;;  %1889 = vmatpush3.bf16.msra.mxu0 %v2089_v18  ;;  %v2151_v18 = vld [vmem:[%s2526_s1 + $0x230] sm:$0xff]  }
  0x2c   : > { %1909 = vmatpush3.bf16.msra.mxu1 %v2090_v19  ;;  %1890 = vmatprep.subr.bf16.mxu0 %v2091_v22  ;;  %v2152_v19 = vld [vmem:[%s2526_s1 + $0x238] sm:$0xff]  }
  0x2d   : > { %1910 = vmatprep.subr.bf16.mxu1 %v2092_v23  ;;  %1904 = vmatprep.mubr.bf16.mxu0 %v2086_v13  ;;  %v2146_v13 = vld [vmem:[%s2526_s1 + $0x208] sm:$0xff]  }
  0x2e   : > { %1924 = vmatprep.mubr.bf16.mxu1 %v2105_v25 }
  0x2f   : > { %1891 = vmatpush3.bf16.msra.mxu0 %v2091_v22 }
  0x30   : > { %1911 = vmatpush3.bf16.msra.mxu1 %v2092_v23  ;;  %1892 = vmatprep.subr.bf16.mxu0 %v2093_v24 }
  0x31   : > { %1912 = vmatprep.subr.bf16.mxu1 %v2094_v26 }
  0x33   : > { %1893 = vmatpush3.bf16.msra.mxu0 %v2093_v24 }
  0x34   : > { %1913 = vmatpush3.bf16.msra.mxu1 %v2094_v26  ;;  %1894 = vmatprep.subr.bf16.mxu0 %v2095_v27 }
  0x35   : > { %1914 = vmatprep.subr.bf16.mxu1 %v2096_v28 }
  0x37   : > { %1895 = vmatpush3.bf16.msra.mxu0 %v2095_v27 }
  0x38   : > { %1915 = vmatpush3.bf16.msra.mxu1 %v2096_v28  ;;  %1896 = vmatprep.subr.bf16.mxu0 %v2097_v29 }
  0x39   : > { %1916 = vmatprep.subr.bf16.mxu1 %v2098_v30 }
  0x3b   : > { %1897 = vmatpush3.bf16.msra.mxu0 %v2097_v29 }
  0x3c   : > { %1917 = vmatpush3.bf16.msra.mxu1 %v2098_v30  ;;  %1898 = vmatprep.subr.bf16.mxu0 %v2099_v31  ;;  %v580_v30 = vlaneseq }
  0x3d   : > { %1918 = vmatprep.subr.bf16.mxu1 %v2100_v32 }
  0x3f   : > { %1899 = vmatpush3.bf16.msra.mxu0 %v2099_v31  ;;  %v2486_v31 = vshrl.u32 %v580_v30, 7 }
  0x40   : > { %1919 = vmatpush3.bf16.msra.mxu1 %v2100_v32  ;;  %1900 = vmatprep.subr.bf16.mxu0 %v2101_v33 }
  0x41   : > { %1920 = vmatprep.subr.bf16.mxu1 %v2102_v34  ;;  %vm582_vm0 = vcmp.lt.s32.totalorder %v2486_v31, 7 }
  0x43   : > { %1901 = vmatpush3.bf16.msra.mxu0 %v2101_v33 }
  0x44   : > { %1921 = vmatpush3.bf16.msra.mxu1 %v2102_v34  ;;  %1902 = vmatprep.subr.bf16.mxu0 %v2103_v35 }
  0x45   : > { %1922 = vmatprep.subr.bf16.mxu1 %v2104_v36 }
  0x47   : > { %1903 = vmatpush3.bf16.msra.mxu0 %v2103_v35 }
  0x48   : > { %1923 = vmatpush3.bf16.msra.mxu1 %v2104_v36  ;;  %1928 = vmatprep.subr.bf16.mxu0 %v2106_v37 }
  0x49   : > { %1948 = vmatprep.subr.bf16.mxu1 %v2107_v38 }
  0x4a   : > { %1905 = vmatmul.mubr.bf16.vlgmr.msra.gmra.mrb[4].mxu0 %v2088_v21 }
  0x4b   : > { %1925 = vmatmul.mubr.bf16.vlgmr.msra.gmra.mrb[4].mxu1 %v2362_v39  ;;  %1929 = vmatpush3.bf16.msra.mxu0 %v2106_v37 }
  0x4c   : > { %1949 = vmatpush3.bf16.msra.mxu1 %v2107_v38  ;;  %1930 = vmatprep.subr.bf16.mxu0 %v2109_v40 }
  0x4d   : > { %1950 = vmatprep.subr.bf16.mxu1 %v2110_v41  ;;  %1944 = vmatprep.mubr.bf16.mxu0 %v2123_v42 }
  0x4e   : > { %1964 = vmatprep.mubr.bf16.mxu1 %v2105_v25 }
  0x4f   : > { %1931 = vmatpush3.bf16.msra.mxu0 %v2109_v40 }
  0x50   : > { %1951 = vmatpush3.bf16.msra.mxu1 %v2110_v41  ;;  %1932 = vmatprep.subr.bf16.mxu0 %v2111_v43 }
  0x51   : > { %1952 = vmatprep.subr.bf16.mxu1 %v2112_v44 }
  0x53   : > { %1933 = vmatpush3.bf16.msra.mxu0 %v2111_v43 }
  0x54   : > { %1953 = vmatpush3.bf16.msra.mxu1 %v2112_v44  ;;  %1934 = vmatprep.subr.bf16.mxu0 %v2113_v45 }
  0x55   : > { %1954 = vmatprep.subr.bf16.mxu1 %v2114_v46 }
  0x57   : > { %1935 = vmatpush3.bf16.msra.mxu0 %v2113_v45 }
  0x58   : > { %1955 = vmatpush3.bf16.msra.mxu1 %v2114_v46  ;;  %1936 = vmatprep.subr.bf16.mxu0 %v2115_v47 }
  0x59   : > { %1956 = vmatprep.subr.bf16.mxu1 %v2116_v48 }
  0x5b   : > { %1937 = vmatpush3.bf16.msra.mxu0 %v2115_v47 }
  0x5c   : > { %1957 = vmatpush3.bf16.msra.mxu1 %v2116_v48  ;;  %1938 = vmatprep.subr.bf16.mxu0 %v2117_v49 }
  0x5d   : > { %1958 = vmatprep.subr.bf16.mxu1 %v2118_v50 }
  0x5f   : > { %1939 = vmatpush3.bf16.msra.mxu0 %v2117_v49 }
  0x60   : > { %1959 = vmatpush3.bf16.msra.mxu1 %v2118_v50  ;;  %1940 = vmatprep.subr.bf16.mxu0 %v2119_v51 }
  0x61   : > { %1960 = vmatprep.subr.bf16.mxu1 %v2120_v52 }
  0x63   : > { %1941 = vmatpush3.bf16.msra.mxu0 %v2119_v51 }
  0x64   : > { %1961 = vmatpush3.bf16.msra.mxu1 %v2120_v52  ;;  %1942 = vmatprep.subr.bf16.mxu0 %v2121_v53 }
  0x65   : > { %1962 = vmatprep.subr.bf16.mxu1 %v2122_v54 }
  0x67   : > { %1943 = vmatpush3.bf16.msra.mxu0 %v2121_v53 }
  0x68   : > { %1963 = vmatpush3.bf16.msra.mxu1 %v2122_v54  ;;  %1968 = vmatprep.subr.bf16.mxu0 %v2125_v55 }
  0x69   : > { %1988 = vmatprep.subr.bf16.mxu1 %v2126_v56 }
  0x6a   : > { %1945 = vmatmul.mubr.bf16.vlgmr.msra.gmra.mrb[8].mxu0 %v2124_v57 }
  0x6b   : > { %1965 = vmatmul.mubr.bf16.vlgmr.msra.gmra.mrb[8].mxu1 %v2362_v39  ;;  %1969 = vmatpush3.bf16.msra.mxu0 %v2125_v55 }
  0x6c   : > { %1989 = vmatpush3.bf16.msra.mxu1 %v2126_v56  ;;  %1970 = vmatprep.subr.bf16.mxu0 %v2127_v58 }
  0x6d   : > { %1990 = vmatprep.subr.bf16.mxu1 %v2128_v59  ;;  %1984 = vmatprep.mubr.bf16.mxu0 %v2141_v60 }
  0x6e   : > { %2004 = vmatprep.mubr.bf16.mxu1 %v2144_v61 }
  0x6f   : > { %1971 = vmatpush3.bf16.msra.mxu0 %v2127_v58 }
  0x70   : > { %1991 = vmatpush3.bf16.msra.mxu1 %v2128_v59  ;;  %1972 = vmatprep.subr.bf16.mxu0 %v2129_v62 }
  0x71   : > { %1992 = vmatprep.subr.bf16.mxu1 %v2130_v63 }
  0x73   : > { %1973 = vmatpush3.bf16.msra.mxu0 %v2129_v62 }
  0x74   : > { %1993 = vmatpush3.bf16.msra.mxu1 %v2130_v63  ;;  %1974 = vmatprep.subr.bf16.mxu0 %v2131_v0 }
  0x75   : > { %1994 = vmatprep.subr.bf16.mxu1 %v2132_v1 }
  0x77   : > { %1975 = vmatpush3.bf16.msra.mxu0 %v2131_v0 }
  0x78   : > { %1995 = vmatpush3.bf16.msra.mxu1 %v2132_v1  ;;  %1976 = vmatprep.subr.bf16.mxu0 %v2133_v2 }
  0x79   : > { %1996 = vmatprep.subr.bf16.mxu1 %v2134_v3 }
  0x7b   : > { %1977 = vmatpush3.bf16.msra.mxu0 %v2133_v2 }
  0x7c   : > { %1997 = vmatpush3.bf16.msra.mxu1 %v2134_v3  ;;  %1978 = vmatprep.subr.bf16.mxu0 %v2135_v4 }
  0x7d   : > { %1998 = vmatprep.subr.bf16.mxu1 %v2136_v5 }
  0x7f   : > { %1979 = vmatpush3.bf16.msra.mxu0 %v2135_v4 }
  0x80   : > { %1999 = vmatpush3.bf16.msra.mxu1 %v2136_v5  ;;  %1980 = vmatprep.subr.bf16.mxu0 %v2137_v6 }
  0x81   : > { %2000 = vmatprep.subr.bf16.mxu1 %v2138_v7 }
  0x83   : > { %1981 = vmatpush3.bf16.msra.mxu0 %v2137_v6 }
  0x84   : > { %2001 = vmatpush3.bf16.msra.mxu1 %v2138_v7  ;;  %1982 = vmatprep.subr.bf16.mxu0 %v2139_v8 }
  0x85   : > { %2002 = vmatprep.subr.bf16.mxu1 %v2140_v9 }
  0x87   : > { %1983 = vmatpush3.bf16.msra.mxu0 %v2139_v8 }
  0x88   : > { %2003 = vmatpush3.bf16.msra.mxu1 %v2140_v9  ;;  %2008 = vmatprep.subr.bf16.mxu0 %v2143_v10 }
  0x8a   : > { %1985 = vmatmul.mubr.bf16.vlgmr.msra.gmra.mrb[12].mxu0 %v2142_v11 }
  0x8b   : > { %2009 = vmatpush3.bf16.msra.mxu0 %v2143_v10  ;;  %2005 = vmatmul.mubr.bf16.vlgmr.msra.gmra.mrb[12].mxu1 %v2145_v12 }
  0x8c   : > { %2010 = vmatprep.subr.bf16.mxu0 %v2146_v13  ;;  %2024 = vmatprep.mubr.bf16.mxu0 %v2141_v60 }
  0x8f   : > { %2011 = vmatpush3.bf16.msra.mxu0 %v2146_v13 }
  0x90   : > { %2012 = vmatprep.subr.bf16.mxu0 %v2147_v14 }
  0x93   : > { %2013 = vmatpush3.bf16.msra.mxu0 %v2147_v14 }
  0x94   : > { %2014 = vmatprep.subr.bf16.mxu0 %v2148_v15 }
  0x97   : > { %2015 = vmatpush3.bf16.msra.mxu0 %v2148_v15 }
  0x98   : > { %2016 = vmatprep.subr.bf16.mxu0 %v2149_v16 }
  0x9b   : > { %2017 = vmatpush3.bf16.msra.mxu0 %v2149_v16 }
  0x9c   : > { %2018 = vmatprep.subr.bf16.mxu0 %v2150_v17 }
  0x9f   : > { %2019 = vmatpush3.bf16.msra.mxu0 %v2150_v17 }
  0xa0   : > { %2020 = vmatprep.subr.bf16.mxu0 %v2151_v18 }
  0xa3   : > { %2021 = vmatpush3.bf16.msra.mxu0 %v2151_v18 }
  0xa4   : > { %2022 = vmatprep.subr.bf16.mxu0 %v2152_v19 }
  0xa7   : > { %2023 = vmatpush3.bf16.msra.mxu0 %v2152_v19 }
  0xaa   : > { %2025 = vmatmul.mubr.bf16.vlgmr.msra.gmra.mrb[16].mxu0 %v2142_v11 }
  0xfd   : > { %v1866_v20 = vpop.f32.mrb[0].mxu0 }
  0xfe   : > { %v1886_v21 = vpop.f32.mrb[0].mxu1  ;;  %v342_v22 = vpop.f32.mrb[1].mxu0 }
  0xff   : > { %v457_v23 = vadd.f32 %v1886_v21, %v1866_v20  ;;  %v449_v24 = vpop.f32.mrb[1].mxu1  ;;  %v1867_v25 = vpop.f32.mrb[2].mxu0 }
 0x100   : > { %v450_v26 = vadd.f32 %v449_v24, %v342_v22  ;;  %v345_v27 = vpop.f32.mrb[3].mxu0  ;;  %v1887_v28 = vpop.f32.mrb[2].mxu1  ;;  %v1742_v25 = vld [vmem:[%s2527_s2] ss:$0 sm:$0xff] }
 0x101   : > { %v452_v29 = vpop.f32.mrb[3].mxu1 }
 0x11d   : > { %v1906_v32 = vpop.f32.mrb[4].mxu0 }
 0x11e   : > { %v578_v33 = vrot.slane %v1906_v32, 1  ;;  %v561_v34 = vpop.f32.mrb[5].mxu0  ;;  %v1926_v35 = vpop.f32.mrb[4].mxu1 }
 0x11f   : > { %v1907_v36 = vpop.f32.mrb[6].mxu0  ;;  %v705_v37 = vpop.f32.mrb[5].mxu1  ;;  %v576_v41 = vrot.slane %v561_v34, 1 }
 0x120   : > { %v579_v38 = vrot.slane %v1907_v36, 1  ;;  %v564_v39 = vpop.f32.mrb[7].mxu0  ;;  %v1927_v40 = vpop.f32.mrb[6].mxu1 }
 0x121   : > { %v577_v42 = vrot.slane %v564_v39, 1  ;;  %v708_v43 = vpop.f32.mrb[7].mxu1 }
 0x122   : > { %v583_v44 = vsel %vm582_vm0, %v578_v33, %v579_v38 }
 0x123   : > { %v586_v45 = vadd.f32 %v583_v44, %v457_v23  ;;  %v584_v46 = vsel %vm582_vm0, %v576_v41, %v577_v42 }
 0x124   : > { %v585_v47 = vadd.f32 %v584_v46, %v450_v26 }
 0x125   : > { %v719_v48 = vadd.f32 %v1926_v35, %v586_v45 }
 0x126   : > { %v718_v49 = vadd.f32 %v705_v37, %v585_v47 }
 0x13d   : > { %v1946_v50 = vpop.f32.mrb[8].mxu0 }
 0x13e   : > { %v852_v51 = vadd.f32 %v1946_v50, %v719_v48  ;;  %v1966_v52 = vpop.f32.mrb[8].mxu1  ;;  %v838_v53 = vpop.f32.mrb[9].mxu0 }
 0x13f   : > { %v969_v54 = vrot.slane %v1966_v52, 1  ;;  %v851_v55 = vadd.f32 %v838_v53, %v718_v49  ;;  %v952_v56 = vpop.f32.mrb[9].mxu1  ;;  %v1947_v57 = vpop.f32.mrb[10].mxu0 }
 0x140   : > { %v967_v58 = vrot.slane %v952_v56, 1  ;;  %v1967_v59 = vpop.f32.mrb[10].mxu1  ;;  %v841_v60 = vpop.f32.mrb[11].mxu0 }
 0x141   : > { %v970_v61 = vrot.slane %v1967_v59, 1  ;;  %v955_v62 = vpop.f32.mrb[11].mxu1 }
 0x142   : > { %v968_v63 = vrot.slane %v955_v62, 1 }
 0x143   : > { %v971_v0 = vsel %vm582_vm0, %v969_v54, %v970_v61 }
 0x144   : > { %v974_v1 = vadd.f32 %v971_v0, %v852_v51  ;;  %v972_v2 = vsel %vm582_vm0, %v967_v58, %v968_v63 }
 0x145   : > { %v973_v3 = vadd.f32 %v972_v2, %v851_v55 }
 0x15d   : > { %v1986_v4 = vpop.f32.mrb[12].mxu0 }
 0x15e   : > { %v1108_v5 = vadd.f32 %v1986_v4, %v974_v1  ;;  %v1094_v6 = vpop.f32.mrb[13].mxu0  ;;  %v2006_v7 = vpop.f32.mrb[12].mxu1 }
 0x15f   : > { %v1107_v8 = vadd.f32 %v1094_v6, %v973_v3  ;;  %v1987_v9 = vpop.f32.mrb[14].mxu0  ;;  %v1227_v10 = vpop.f32.mrb[13].mxu1 }
 0x160   : > { %v1241_v11 = vadd.f32 %v2006_v7, %v1108_v5  ;;  %v1097_v12 = vpop.f32.mrb[15].mxu0  ;;  %v2007_v13 = vpop.f32.mrb[14].mxu1 }
 0x161   : > { %v1240_v14 = vadd.f32 %v1227_v10, %v1107_v8  ;;  %v1230_v15 = vpop.f32.mrb[15].mxu1 }
 0x17d   : > { %v2026_v16 = vpop.f32.mrb[16].mxu0 }
 0x17e   : > { %v1341_v17 = vpop.f32.mrb[17].mxu0  ;;  %v1358_v19 = vrot.slane %v2026_v16, 1 }
 0x17f   : > { %v2027_v18 = vpop.f32.mrb[18].mxu0  ;;  %v1356_v22 = vrot.slane %v1341_v17, 1 }
 0x180   : > { %v1359_v20 = vrot.slane %v2027_v18, 1  ;;  %v1344_v21 = vpop.f32.mrb[19].mxu0 }
 0x181   : > { %v1357_v23 = vrot.slane %v1344_v21, 1 }
 0x182   : > { %v1360_v24 = vsel %vm582_vm0, %v1358_v19, %v1359_v20 }
 0x183   : > { %v1363_v26 = vadd.f32 %v1360_v24, %v1241_v11  ;;  %v1361_v27 = vsel %vm582_vm0, %v1356_v22, %v1357_v23 }
 0x184   : > { %v1362_v28 = vadd.f32 %v1361_v27, %v1240_v14 }
 0x185   : > { %v1372_v29 = vadd.f32 %v1742_v25, %v1363_v26 }
 0x186   : > { %v1371_v30 = vadd.f32 %v1742_v25, %v1362_v28 }
 0x187   : > { %v1374_v32 = vmax.f32 %v1372_v29, 0.0 }
 0x188   : > { %v1373_v33 = vmax.f32 %v1371_v30, 0.0 }
 0x18a   : > { %v1756_v34 = vpack.c.bf16 %v1374_v32, %v1373_v33 }
 0x18c   : > { %1757 = vst [vmem:[%s197_s21] sm:$0xff] %v1756_v34  }
 0x18d PF: > { %s13_s16 = sadd.s32 1, %s2191_s16   ;;  %s2529_s12 = smov %s2183_s14 }
 0x18e   : > { %p10_p8 = scmp.ge.s32.totalorder %s13_s16, 10   ;;  %s2530_s13 = smov %s2187_s15 }
 0x18f   : > { %s2531_s14 = smov %s2534_s17  ;;  %s2532_s15 = smov %s2538_s18 }
 0x190   :  { %12 = sbr.rel (!%p10_p8) target bundleno = 3 (0x3), region = 76 }

// kernel: bottleneck_forward.5
= control target key start
LH: loop header
LB: loop body
LE: loop exit
PB: predicated region body
PF: predicated region fallthrough
CT: control target
= control target key end

     0   :  { %s795_s18 = smov 0   ;;  %s871_s0 = inlined_call_operand.vmem [shape: bf16[128,128], index: 0, kind: input, shape index: {}]   ;;  %s872_s1 = inlined_call_operand.vmem [shape: bf16[128,128], index: 1, kind: input, shape index: {}]   ;;  %s873_s2 = inlined_call_operand.vmem [shape: bf16[128,128], index: 2, kind: input, shape index: {}]   ;;  %s874_s3 = inlined_call_operand.vmem [shape: bf16[128,128], index: 3, kind: input, shape index: {}]   ;;  %s875_s4 = inlined_call_operand.vmem [shape: f32[1,128], index: 4, kind: input, shape index: {}]   ;;  %s876_s5 = inlined_call_operand.vmem [shape: bf16[128,128], index: 5, kind: output, shape index: {}]  }
   0x1 LB: > { %s612_s19 = sadd.s32 4294967295, %s763_s18   ;;  %p616_p0 = scmp.ge.s32.totalorder %s763_s18, 1  ;;  %s763_s18 = sphi %s795_s18, %s15_s18  }
   0x2   : > { %p199_p1 = scmp.lt.s32.totalorder %s763_s18, 5 }
   0x4   : > { %p200_p2 = pnand %p616_p0, %p199_p1 }
   0x5   : > { %v737_v0 = vld [vmem:[%s874_s3] sm:$0xff] (!%p200_p2)   ;;  %s617_s22 = sshll.u32 (!%p200_p2), %s612_s19, 2  ;;  %v739_v2 = vld [vmem:[%s874_s3 + $0x8] sm:$0xff] (!%p200_p2)   ;;  %v741_v4 = vld [vmem:[%s874_s3 + $0x10] sm:$0xff] (!%p200_p2)  }
   0x6   : > { %203 = sbr.rel (%p200_p2) target bundleno = 263 (0x107), region = 40  ;;  %v738_v1 = vld [vmem:[%s872_s1] sm:$0xff] (!%p200_p2)   ;;  %685 = vmatprep.subr.bf16.mxu1 (!%p200_p2), %v737_v0  ;;  %p233_p3 = scmp.lt.s32.totalorder (!%p200_p2), %s617_s22, 15  ;;  %v740_v3 = vld [vmem:[%s872_s1 + $0x8] sm:$0xff] (!%p200_p2)   ;;  %v742_v5 = vld [vmem:[%s872_s1 + $0x10] sm:$0xff] (!%p200_p2)  }
   0x7   : > { %705 = vmatprep.subr.bf16.mxu0 (!%p200_p2), %v738_v1  ;;  %686 = vmatpush3.bf16.msra.mxu1 (!%p200_p2), %v737_v0  ;;  %v743_v6 = vld [vmem:[%s874_s3 + $0x18] sm:$0xff] (!%p200_p2)   ;;  %v745_v8 = vld [vmem:[%s874_s3 + $0x20] sm:$0xff] (!%p200_p2)   ;;  %v747_v10 = vld [vmem:[%s874_s3 + $0x28] sm:$0xff] (!%p200_p2)  }
   0x8   : > { %706 = vmatpush3.bf16.msra.mxu0 (!%p200_p2), %v738_v1  ;;  %687 = vmatprep.subr.bf16.mxu1 (!%p200_p2), %v739_v2  ;;  %v744_v7 = vld [vmem:[%s872_s1 + $0x18] sm:$0xff] (!%p200_p2)   ;;  %v746_v9 = vld [vmem:[%s872_s1 + $0x20] sm:$0xff] (!%p200_p2)   ;;  %v748_v11 = vld [vmem:[%s872_s1 + $0x28] sm:$0xff] (!%p200_p2)  }
   0x9   : > { %707 = vmatprep.subr.bf16.mxu0 (!%p200_p2), %v740_v3  ;;  %v749_v14 = vld [vmem:[%s874_s3 + $0x30] sm:$0xff] (!%p200_p2)   ;;  %v751_v16 = vld [vmem:[%s874_s3 + $0x38] sm:$0xff] (!%p200_p2)   ;;  %v643_v22 = vld [vmem:[%s875_s4] ss:$0 sm:$0xff] (!%p200_p2) }
   0xa   : > { %v750_v15 = vld [vmem:[%s872_s1 + $0x30] sm:$0xff] (!%p200_p2)   ;;  %v752_v17 = vld [vmem:[%s872_s1 + $0x38] sm:$0xff] (!%p200_p2)  }
   0xb   : > { %688 = vmatpush3.bf16.msra.mxu1 (!%p200_p2), %v739_v2 }
   0xc   : > { %708 = vmatpush3.bf16.msra.mxu0 (!%p200_p2), %v740_v3  ;;  %689 = vmatprep.subr.bf16.mxu1 (!%p200_p2), %v741_v4 }
   0xd   : > { %s878_s22 = smov (!%p233_p3, %s617_s22), 15  ;;  %709 = vmatprep.subr.bf16.mxu0 %v742_v5 }
   0xe   : > { %s827_s12 = sshll.u32 %s878_s22, 2 }
   0xf   : > { %690 = vmatpush3.bf16.msra.mxu1 %v741_v4  ;;  %s242_s20 = scalar_lea.vmem %s873_s2, %s827_s12  ;;  %s236_s25 = scalar_lea.vmem %s871_s0, %s827_s12 }
  0x10   : > { %710 = vmatpush3.bf16.msra.mxu0 %v742_v5  ;;  %691 = vmatprep.subr.bf16.mxu1 %v743_v6  ;;  %v753_v12 = vld [vmem:[%s242_s20] sm:$0xff]   ;;  %v755_v18 = vld [vmem:[%s242_s20 + $0x8] sm:$0xff]   ;;  %s248_s16 = scalar_lea.vmem %s876_s5, %s827_s12 }
  0x11   : > { %711 = vmatprep.subr.bf16.mxu0 %v744_v7  ;;  %v754_v13 = vld [vmem:[%s236_s25] sm:$0xff]   ;;  %701 = vmatprep.mubr.bf16.mxu1 %v753_v12  ;;  %v756_v19 = vld [vmem:[%s236_s25 + $0x8] sm:$0xff]  }
  0x12   : > { %721 = vmatprep.mubr.bf16.mxu0 %v754_v13 }
  0x13   : > { %692 = vmatpush3.bf16.msra.mxu1 %v743_v6 }
  0x14   : > { %712 = vmatpush3.bf16.msra.mxu0 %v744_v7  ;;  %693 = vmatprep.subr.bf16.mxu1 %v745_v8 }
  0x15   : > { %713 = vmatprep.subr.bf16.mxu0 %v746_v9 }
  0x17   : > { %694 = vmatpush3.bf16.msra.mxu1 %v745_v8 }
  0x18   : > { %714 = vmatpush3.bf16.msra.mxu0 %v746_v9  ;;  %695 = vmatprep.subr.bf16.mxu1 %v747_v10 }
  0x19   : > { %715 = vmatprep.subr.bf16.mxu0 %v748_v11 }
  0x1b   : > { %696 = vmatpush3.bf16.msra.mxu1 %v747_v10 }
  0x1c   : > { %716 = vmatpush3.bf16.msra.mxu0 %v748_v11  ;;  %697 = vmatprep.subr.bf16.mxu1 %v749_v14 }
  0x1d   : > { %717 = vmatprep.subr.bf16.mxu0 %v750_v15 }
  0x1f   : > { %698 = vmatpush3.bf16.msra.mxu1 %v749_v14 }
  0x20   : > { %718 = vmatpush3.bf16.msra.mxu0 %v750_v15  ;;  %699 = vmatprep.subr.bf16.mxu1 %v751_v16 }
  0x21   : > { %719 = vmatprep.subr.bf16.mxu0 %v752_v17 }
  0x23   : > { %700 = vmatpush3.bf16.msra.mxu1 %v751_v16 }
  0x24   : > { %720 = vmatpush3.bf16.msra.mxu0 %v752_v17 }
  0x26   : > { %702 = vmatmul.mubr.bf16.vlgmr.msra.gmra.mrb[0].mxu1 %v755_v18 }
  0x27   : > { %722 = vmatmul.mubr.bf16.vlgmr.msra.gmra.mrb[0].mxu0 %v756_v19 }
  0xf9   : > { %v703_v20 = vpop.f32.mrb[0].mxu1 }
  0xfa   : > { %v723_v21 = vpop.f32.mrb[0].mxu0  ;;  %v385_v23 = vpop.f32.mrb[1].mxu1 }
  0xfb   : > { %v503_v24 = vadd.f32 %v723_v21, %v703_v20  ;;  %v494_v25 = vpop.f32.mrb[1].mxu0  ;;  %v704_v26 = vpop.f32.mrb[2].mxu1 }
  0xfc   : > { %v495_v27 = vadd.f32 %v494_v25, %v385_v23  ;;  %v724_v28 = vpop.f32.mrb[2].mxu0  ;;  %v388_v29 = vpop.f32.mrb[3].mxu1 }
  0xfd   : > { %v518_v30 = vadd.f32 %v643_v22, %v503_v24  ;;  %v506_v31 = vadd.f32 %v724_v28, %v704_v26  ;;  %v497_v32 = vpop.f32.mrb[3].mxu0 }
  0xfe   : > { %v516_v33 = vadd.f32 %v643_v22, %v495_v27  ;;  %v498_v34 = vadd.f32 %v497_v32, %v388_v29 }
  0xff   : > { %v519_v35 = vadd.f32 %v643_v22, %v506_v31  ;;  %v522_v37 = vmax.f32 %v518_v30, 0.0 }
 0x100   : > { %v517_v36 = vadd.f32 %v643_v22, %v498_v34  ;;  %v520_v39 = vmax.f32 %v516_v33, 0.0 }
 0x101   : > { %v523_v38 = vmax.f32 %v519_v35, 0.0 }
 0x102   : > { %v521_v40 = vmax.f32 %v517_v36, 0.0 }
 0x103   : > { %v662_v41 = vpack.c.bf16 %v523_v38, %v522_v37 }
 0x104   : > { %v657_v42 = vpack.c.bf16 %v521_v40, %v520_v39 }
 0x105   : > { %664 = vst [vmem:[%s248_s16 + $0x8] sm:$0xff] %v662_v41  }
 0x106   : > { %658 = vst [vmem:[%s248_s16] sm:$0xff] %v657_v42  }
 0x107 PF: > { %s15_s18 = sadd.s32 1, %s763_s18  }
 0x108   : > { %p12_p4 = scmp.ge.s32.totalorder %s15_s18, 6  }
 0x10a   :  { %14 = sbr.rel (!%p12_p4) target bundleno = 1 (0x1), region = 73 }

</bundles_post_ra>
